<compile_context>
chip_gen: v6e
topology: v6e:2x2x1
jax: 0.10.0
libtpu: 0.0.40
codegen_flags: <defaults>
</compile_context>

<pallas_src>
import math
import functools

import jax
import jax.numpy as jnp
from jax.experimental import pallas as pl
from jax.experimental.pallas import tpu as pltpu


def _affine_vpu(x, w_ref, b_ref, col0, ncols):
    """y[l, n, f] = sum_e x[l, n, e] * w_ref[e, col0+f] + b_ref[0, col0+f].

    The contraction dim E equals num_heads (tiny), so this runs entirely on the
    VPU as an unrolled broadcast-multiply-accumulate: no MXU latency, no
    reshapes, no transposes.
    """
    E = x.shape[-1]
    y = x[:, :, 0:1] * w_ref[0:1, col0:col0 + ncols]
    for e in range(1, E):                       # static unroll, E == num_heads
        y = y + x[:, :, e:e + 1] * w_ref[e:e + 1, col0:col0 + ncols]
    return y + b_ref[:, col0:col0 + ncols]


def _mha_kernel(gr_ref, q_ref, k_ref, v_ref,
                w_in_ref, b_in_ref, w_out_ref, b_out_ref,
                o_ref, *, num_heads):
    L, N, E = q_ref.shape
    head_dim = E // num_heads                   # == 1 (embed_dim == num_heads)
    scale = 1.0 / math.sqrt(head_dim)

    # Per-batch gear-ratio scaling (broadcast over seq; (1, N, E) slab).
    g = gr_ref[...]
    q_in = q_ref[...] * g                       # (L, N, E)
    k_in = k_ref[...] * g
    v_in = v_ref[...] * g

    # Input projections against the fused [Wq^T | Wk^T | Wv^T] / [bq | bk | bv] operands.
    qp = _affine_vpu(q_in, w_in_ref, b_in_ref, 0 * E, E) * scale
    kp = _affine_vpu(k_in, w_in_ref, b_in_ref, 1 * E, E)
    vp = _affine_vpu(v_in, w_in_ref, b_in_ref, 2 * E, E)

    # head_dim == 1: scores[l, s, n, h] = scale * q[l, n, h] * k[s, n, h].
    # Pure leading-dim broadcasts; (batch, head) stay on the (sublane, lane) tile dims.
    scores = qp[:, None, :, :] * kp[None, :, :, :]            # (L, S, N, E)
    m = jnp.max(scores, axis=1, keepdims=True)                # (L, 1, N, E)
    p = jnp.exp(scores - m)
    denom = jnp.sum(p, axis=1, keepdims=True)                 # (L, 1, N, E)
    p = p * pl.reciprocal(denom, approx=True)                 # EUP reciprocal
    ctx = jnp.sum(p * vp[None, :, :, :], axis=1)              # (L, N, E)

    # Output projection.
    o_ref[...] = _affine_vpu(ctx, w_out_ref, b_out_ref, 0, E)


def custom_attention_pallas(query, key, value, gear_ratios, params, num_heads):
    """query/key/value: (L, N, E) float32 with E == num_heads. Returns (L, N, E)."""
    L, N, E = query.shape
    assert E == num_heads, "module defines embed_dim == num_heads"
    assert E // num_heads == 1, "kernel assumes head_dim == 1 (guaranteed by the module)"
    assert len(gear_ratios) == N

    # Gear ratios are a static Python list -> build the (1, N, E) broadcast slab once.
    gr = jnp.broadcast_to(
        jnp.asarray(gear_ratios, jnp.float32).reshape(1, N, 1), (1, N, E))

    # Fused projection operands.
    w_in_t = jnp.asarray(params["in_proj_weight"], jnp.float32).T       # (E, 3E)
    b_in = jnp.asarray(params["in_proj_bias"], jnp.float32).reshape(1, 3 * E)
    w_out_t = jnp.asarray(params["out_proj_weight"], jnp.float32).T     # (E, E)
    b_out = jnp.asarray(params["out_proj_bias"], jnp.float32).reshape(1, E)

    def full(shape):
        return pl.BlockSpec(shape, lambda *_: (0,) * len(shape))

    out = pl.pallas_call(
        functools.partial(_mha_kernel, num_heads=num_heads),
        out_shape=jax.ShapeDtypeStruct((L, N, E), jnp.float32),
        grid=(1,),                                   # single grid step
        in_specs=[
            full((1, N, E)),        # gear-ratio broadcast slab
            full((L, N, E)),        # query  (native layout, no transposes)
            full((L, N, E)),        # key
            full((L, N, E)),        # value
            full((E, 3 * E)),       # [Wq^T | Wk^T | Wv^T]
            full((1, 3 * E)),       # [bq | bk | bv]
            full((E, E)),           # Wo^T
            full((1, E)),           # bo
        ],
        out_specs=full((L, N, E)),
        compiler_params=pltpu.CompilerParams(
            dimension_semantics=("arbitrary",)),     # tiny 1-step grid: no megacore sharding
    )(gr, query, key, value, w_in_t, b_in, w_out_t, b_out)

    return out


def custom_attention_ref(query, key, value, gear_ratios, params, num_heads):
    """Pure-JAX reference mirroring torch.nn.MultiheadAttention forward."""
    L, N, E = query.shape
    scaling = jnp.asarray(gear_ratios, jnp.float32)[None, :, None]
    q, k, v = query * scaling, key * scaling, value * scaling
    in_w, in_b = params["in_proj_weight"], params["in_proj_bias"]
    qp = q @ in_w[:E].T + in_b[:E]
    kp = k @ in_w[E:2 * E].T + in_b[E:2 * E]
    vp = v @ in_w[2 * E:].T + in_b[2 * E:]
    hd = E // num_heads

    def split(x):  # (L, N, E) -> (N, H, L, hd)
        return x.reshape(L, N, num_heads, hd).transpose(1, 2, 0, 3)

    qh, kh, vh = split(qp), split(kp), split(vp)
    scores = jnp.einsum("nhld,nhsd->nhls", qh * (hd ** -0.5), kh)
    p = jax.nn.softmax(scores, axis=-1)
    ctx = jnp.einsum("nhls,nhsd->nhld", p, vh)
    ctx = ctx.transpose(2, 0, 1, 3).reshape(L, N, E)
    return ctx @ params["out_proj_weight"].T + params["out_proj_bias"]


if __name__ == "__main__":
    num_heads = 4              # embed_dim == num_heads per the module
    E = num_heads
    L, N = 8, 2                # seq len, batch
    gear_ratios = [1.0, 0.5]   # length must equal batch (broadcast over dim 1)

    key0 = jax.random.PRNGKey(0)
    kq, kk, kv, kw, kb, kow, kob = jax.random.split(key0, 7)

    query = jax.random.normal(kq, (L, N, E), jnp.float32)
    key_t = jax.random.normal(kk, (L, N, E), jnp.float32)
    value = jax.random.normal(kv, (L, N, E), jnp.float32)

    params = {
        "in_proj_weight": 0.3 * jax.random.normal(kw, (3 * E, E), jnp.float32),
        "in_proj_bias":   0.1 * jax.random.normal(kb, (3 * E,), jnp.float32),
        "out_proj_weight": 0.3 * jax.random.normal(kow, (E, E), jnp.float32),
        "out_proj_bias":   0.1 * jax.random.normal(kob, (E,), jnp.float32),
    }

    out = custom_attention_pallas(query, key_t, value, gear_ratios, params, num_heads)
    out = jax.block_until_ready(out)

    ref = custom_attention_ref(query, key_t, value, gear_ratios, params, num_heads)
    assert out.shape == (L, N, E)
    # Tolerance accounts for the approximate (EUP) reciprocal in the softmax normalization.
    assert jnp.allclose(out, ref, atol=1e-2, rtol=1e-2), "mismatch vs JAX reference"

    print("KERNEL_OK")
</pallas_src>

<mosaic_0001>
module attributes {stable_mosaic.version = 11 : i64} {
  func.func @_mha_kernel(%arg0: i32, %arg1: memref<1x2x4xf32, #tpu.memory_space<vmem>>, %arg2: memref<8x2x4xf32, #tpu.memory_space<vmem>>, %arg3: memref<8x2x4xf32, #tpu.memory_space<vmem>>, %arg4: memref<8x2x4xf32, #tpu.memory_space<vmem>>, %arg5: memref<4x12xf32, #tpu.memory_space<vmem>>, %arg6: memref<1x12xf32, #tpu.memory_space<vmem>>, %arg7: memref<4x4xf32, #tpu.memory_space<vmem>>, %arg8: memref<1x4xf32, #tpu.memory_space<vmem>>, %arg9: memref<8x2x4xf32, #tpu.memory_space<vmem>>) attributes {dimension_semantics = [#tpu.dimension_semantics<arbitrary>], iteration_bounds = array<i64: 1>, scalar_prefetch = 0 : i64, scratch_operands = 0 : i64, tpu.core_type = #tpu.core_type<tc>, window_params = [{pipeline_mode = #tpu.pipeline_mode<synchronous>, transform_indices = @transform_0, window_bounds = array<i64: 1, 2, 4>}, {pipeline_mode = #tpu.pipeline_mode<synchronous>, transform_indices = @transform_1, window_bounds = array<i64: 8, 2, 4>}, {pipeline_mode = #tpu.pipeline_mode<synchronous>, transform_indices = @transform_2, window_bounds = array<i64: 8, 2, 4>}, {pipeline_mode = #tpu.pipeline_mode<synchronous>, transform_indices = @transform_3, window_bounds = array<i64: 8, 2, 4>}, {pipeline_mode = #tpu.pipeline_mode<synchronous>, transform_indices = @transform_4, window_bounds = array<i64: 4, 12>}, {pipeline_mode = #tpu.pipeline_mode<synchronous>, transform_indices = @transform_5, window_bounds = array<i64: 1, 12>}, {pipeline_mode = #tpu.pipeline_mode<synchronous>, transform_indices = @transform_6, window_bounds = array<i64: 4, 4>}, {pipeline_mode = #tpu.pipeline_mode<synchronous>, transform_indices = @transform_7, window_bounds = array<i64: 1, 4>}, {pipeline_mode = #tpu.pipeline_mode<synchronous>, transform_indices = @transform_8, window_bounds = array<i64: 8, 2, 4>}]} {
    %c0 = arith.constant 0 : index
    %c0_0 = arith.constant 0 : index
    %c0_1 = arith.constant 0 : index
    %0 = vector.load %arg1[%c0, %c0_0, %c0_1] : memref<1x2x4xf32, #tpu.memory_space<vmem>>, vector<1x2x4xf32>
    %c0_2 = arith.constant 0 : index
    %c0_3 = arith.constant 0 : index
    %c0_4 = arith.constant 0 : index
    %1 = vector.load %arg2[%c0_2, %c0_3, %c0_4] : memref<8x2x4xf32, #tpu.memory_space<vmem>>, vector<8x2x4xf32>
    %2 = vector.broadcast %0 : vector<1x2x4xf32> to vector<8x2x4xf32>
    %3 = arith.mulf %1, %2 : vector<8x2x4xf32>
    %c0_5 = arith.constant 0 : index
    %c0_6 = arith.constant 0 : index
    %c0_7 = arith.constant 0 : index
    %4 = vector.load %arg3[%c0_5, %c0_6, %c0_7] : memref<8x2x4xf32, #tpu.memory_space<vmem>>, vector<8x2x4xf32>
    %5 = vector.broadcast %0 : vector<1x2x4xf32> to vector<8x2x4xf32>
    %6 = arith.mulf %4, %5 : vector<8x2x4xf32>
    %c0_8 = arith.constant 0 : index
    %c0_9 = arith.constant 0 : index
    %c0_10 = arith.constant 0 : index
    %7 = vector.load %arg4[%c0_8, %c0_9, %c0_10] : memref<8x2x4xf32, #tpu.memory_space<vmem>>, vector<8x2x4xf32>
    %8 = vector.broadcast %0 : vector<1x2x4xf32> to vector<8x2x4xf32>
    %9 = arith.mulf %7, %8 : vector<8x2x4xf32>
    %10 = vector.extract_strided_slice %3 {offsets = [0, 0, 0], sizes = [8, 2, 1], strides = [1, 1, 1]} : vector<8x2x4xf32> to vector<8x2x1xf32>
    %c0_11 = arith.constant 0 : index
    %c0_12 = arith.constant 0 : index
    %11 = vector.load %arg5[%c0_11, %c0_12] : memref<4x12xf32, #tpu.memory_space<vmem>>, vector<1x4xf32>
    %12 = vector.shape_cast %11 : vector<1x4xf32> to vector<1x1x4xf32>
    %13 = vector.broadcast %10 : vector<8x2x1xf32> to vector<8x2x4xf32>
    %14 = vector.broadcast %12 : vector<1x1x4xf32> to vector<8x2x4xf32>
    %15 = arith.mulf %13, %14 : vector<8x2x4xf32>
    %16 = vector.extract_strided_slice %3 {offsets = [0, 0, 1], sizes = [8, 2, 1], strides = [1, 1, 1]} : vector<8x2x4xf32> to vector<8x2x1xf32>
    %c1 = arith.constant 1 : index
    %c0_13 = arith.constant 0 : index
    %17 = vector.load %arg5[%c1, %c0_13] : memref<4x12xf32, #tpu.memory_space<vmem>>, vector<1x4xf32>
    %18 = vector.shape_cast %17 : vector<1x4xf32> to vector<1x1x4xf32>
    %19 = vector.broadcast %16 : vector<8x2x1xf32> to vector<8x2x4xf32>
    %20 = vector.broadcast %18 : vector<1x1x4xf32> to vector<8x2x4xf32>
    %21 = arith.mulf %19, %20 : vector<8x2x4xf32>
    %22 = arith.addf %15, %21 : vector<8x2x4xf32>
    %23 = vector.extract_strided_slice %3 {offsets = [0, 0, 2], sizes = [8, 2, 1], strides = [1, 1, 1]} : vector<8x2x4xf32> to vector<8x2x1xf32>
    %c2 = arith.constant 2 : index
    %c0_14 = arith.constant 0 : index
    %24 = vector.load %arg5[%c2, %c0_14] : memref<4x12xf32, #tpu.memory_space<vmem>>, vector<1x4xf32>
    %25 = vector.shape_cast %24 : vector<1x4xf32> to vector<1x1x4xf32>
    %26 = vector.broadcast %23 : vector<8x2x1xf32> to vector<8x2x4xf32>
    %27 = vector.broadcast %25 : vector<1x1x4xf32> to vector<8x2x4xf32>
    %28 = arith.mulf %26, %27 : vector<8x2x4xf32>
    %29 = arith.addf %22, %28 : vector<8x2x4xf32>
    %30 = vector.extract_strided_slice %3 {offsets = [0, 0, 3], sizes = [8, 2, 1], strides = [1, 1, 1]} : vector<8x2x4xf32> to vector<8x2x1xf32>
    %c3 = arith.constant 3 : index
    %c0_15 = arith.constant 0 : index
    %31 = vector.load %arg5[%c3, %c0_15] : memref<4x12xf32, #tpu.memory_space<vmem>>, vector<1x4xf32>
    %32 = vector.shape_cast %31 : vector<1x4xf32> to vector<1x1x4xf32>
    %33 = vector.broadcast %30 : vector<8x2x1xf32> to vector<8x2x4xf32>
    %34 = vector.broadcast %32 : vector<1x1x4xf32> to vector<8x2x4xf32>
    %35 = arith.mulf %33, %34 : vector<8x2x4xf32>
    %36 = arith.addf %29, %35 : vector<8x2x4xf32>
    %c0_16 = arith.constant 0 : index
    %c0_17 = arith.constant 0 : index
    %37 = vector.load %arg6[%c0_16, %c0_17] : memref<1x12xf32, #tpu.memory_space<vmem>>, vector<1x4xf32>
    %38 = vector.shape_cast %37 : vector<1x4xf32> to vector<1x1x4xf32>
    %39 = vector.broadcast %38 : vector<1x1x4xf32> to vector<8x2x4xf32>
    %40 = arith.addf %36, %39 : vector<8x2x4xf32>
    %cst = arith.constant 1.000000e+00 : f32
    %41 = vector.broadcast %cst : f32 to vector<8x2x4xf32>
    %42 = arith.mulf %40, %41 : vector<8x2x4xf32>
    %43 = vector.extract_strided_slice %6 {offsets = [0, 0, 0], sizes = [8, 2, 1], strides = [1, 1, 1]} : vector<8x2x4xf32> to vector<8x2x1xf32>
    %c0_18 = arith.constant 0 : index
    %c4 = arith.constant 4 : index
    %44 = vector.load %arg5[%c0_18, %c4] : memref<4x12xf32, #tpu.memory_space<vmem>>, vector<1x4xf32>
    %45 = vector.shape_cast %44 : vector<1x4xf32> to vector<1x1x4xf32>
    %46 = vector.broadcast %43 : vector<8x2x1xf32> to vector<8x2x4xf32>
    %47 = vector.broadcast %45 : vector<1x1x4xf32> to vector<8x2x4xf32>
    %48 = arith.mulf %46, %47 : vector<8x2x4xf32>
    %49 = vector.extract_strided_slice %6 {offsets = [0, 0, 1], sizes = [8, 2, 1], strides = [1, 1, 1]} : vector<8x2x4xf32> to vector<8x2x1xf32>
    %c1_19 = arith.constant 1 : index
    %c4_20 = arith.constant 4 : index
    %50 = vector.load %arg5[%c1_19, %c4_20] : memref<4x12xf32, #tpu.memory_space<vmem>>, vector<1x4xf32>
    %51 = vector.shape_cast %50 : vector<1x4xf32> to vector<1x1x4xf32>
    %52 = vector.broadcast %49 : vector<8x2x1xf32> to vector<8x2x4xf32>
    %53 = vector.broadcast %51 : vector<1x1x4xf32> to vector<8x2x4xf32>
    %54 = arith.mulf %52, %53 : vector<8x2x4xf32>
    %55 = arith.addf %48, %54 : vector<8x2x4xf32>
    %56 = vector.extract_strided_slice %6 {offsets = [0, 0, 2], sizes = [8, 2, 1], strides = [1, 1, 1]} : vector<8x2x4xf32> to vector<8x2x1xf32>
    %c2_21 = arith.constant 2 : index
    %c4_22 = arith.constant 4 : index
    %57 = vector.load %arg5[%c2_21, %c4_22] : memref<4x12xf32, #tpu.memory_space<vmem>>, vector<1x4xf32>
    %58 = vector.shape_cast %57 : vector<1x4xf32> to vector<1x1x4xf32>
    %59 = vector.broadcast %56 : vector<8x2x1xf32> to vector<8x2x4xf32>
    %60 = vector.broadcast %58 : vector<1x1x4xf32> to vector<8x2x4xf32>
    %61 = arith.mulf %59, %60 : vector<8x2x4xf32>
    %62 = arith.addf %55, %61 : vector<8x2x4xf32>
    %63 = vector.extract_strided_slice %6 {offsets = [0, 0, 3], sizes = [8, 2, 1], strides = [1, 1, 1]} : vector<8x2x4xf32> to vector<8x2x1xf32>
    %c3_23 = arith.constant 3 : index
    %c4_24 = arith.constant 4 : index
    %64 = vector.load %arg5[%c3_23, %c4_24] : memref<4x12xf32, #tpu.memory_space<vmem>>, vector<1x4xf32>
    %65 = vector.shape_cast %64 : vector<1x4xf32> to vector<1x1x4xf32>
    %66 = vector.broadcast %63 : vector<8x2x1xf32> to vector<8x2x4xf32>
    %67 = vector.broadcast %65 : vector<1x1x4xf32> to vector<8x2x4xf32>
    %68 = arith.mulf %66, %67 : vector<8x2x4xf32>
    %69 = arith.addf %62, %68 : vector<8x2x4xf32>
    %c0_25 = arith.constant 0 : index
    %c4_26 = arith.constant 4 : index
    %70 = vector.load %arg6[%c0_25, %c4_26] : memref<1x12xf32, #tpu.memory_space<vmem>>, vector<1x4xf32>
    %71 = vector.shape_cast %70 : vector<1x4xf32> to vector<1x1x4xf32>
    %72 = vector.broadcast %71 : vector<1x1x4xf32> to vector<8x2x4xf32>
    %73 = arith.addf %69, %72 : vector<8x2x4xf32>
    %74 = vector.extract_strided_slice %9 {offsets = [0, 0, 0], sizes = [8, 2, 1], strides = [1, 1, 1]} : vector<8x2x4xf32> to vector<8x2x1xf32>
    %c0_27 = arith.constant 0 : index
    %c8 = arith.constant 8 : index
    %75 = vector.load %arg5[%c0_27, %c8] : memref<4x12xf32, #tpu.memory_space<vmem>>, vector<1x4xf32>
    %76 = vector.shape_cast %75 : vector<1x4xf32> to vector<1x1x4xf32>
    %77 = vector.broadcast %74 : vector<8x2x1xf32> to vector<8x2x4xf32>
    %78 = vector.broadcast %76 : vector<1x1x4xf32> to vector<8x2x4xf32>
    %79 = arith.mulf %77, %78 : vector<8x2x4xf32>
    %80 = vector.extract_strided_slice %9 {offsets = [0, 0, 1], sizes = [8, 2, 1], strides = [1, 1, 1]} : vector<8x2x4xf32> to vector<8x2x1xf32>
    %c1_28 = arith.constant 1 : index
    %c8_29 = arith.constant 8 : index
    %81 = vector.load %arg5[%c1_28, %c8_29] : memref<4x12xf32, #tpu.memory_space<vmem>>, vector<1x4xf32>
    %82 = vector.shape_cast %81 : vector<1x4xf32> to vector<1x1x4xf32>
    %83 = vector.broadcast %80 : vector<8x2x1xf32> to vector<8x2x4xf32>
    %84 = vector.broadcast %82 : vector<1x1x4xf32> to vector<8x2x4xf32>
    %85 = arith.mulf %83, %84 : vector<8x2x4xf32>
    %86 = arith.addf %79, %85 : vector<8x2x4xf32>
    %87 = vector.extract_strided_slice %9 {offsets = [0, 0, 2], sizes = [8, 2, 1], strides = [1, 1, 1]} : vector<8x2x4xf32> to vector<8x2x1xf32>
    %c2_30 = arith.constant 2 : index
    %c8_31 = arith.constant 8 : index
    %88 = vector.load %arg5[%c2_30, %c8_31] : memref<4x12xf32, #tpu.memory_space<vmem>>, vector<1x4xf32>
    %89 = vector.shape_cast %88 : vector<1x4xf32> to vector<1x1x4xf32>
    %90 = vector.broadcast %87 : vector<8x2x1xf32> to vector<8x2x4xf32>
    %91 = vector.broadcast %89 : vector<1x1x4xf32> to vector<8x2x4xf32>
    %92 = arith.mulf %90, %91 : vector<8x2x4xf32>
    %93 = arith.addf %86, %92 : vector<8x2x4xf32>
    %94 = vector.extract_strided_slice %9 {offsets = [0, 0, 3], sizes = [8, 2, 1], strides = [1, 1, 1]} : vector<8x2x4xf32> to vector<8x2x1xf32>
    %c3_32 = arith.constant 3 : index
    %c8_33 = arith.constant 8 : index
    %95 = vector.load %arg5[%c3_32, %c8_33] : memref<4x12xf32, #tpu.memory_space<vmem>>, vector<1x4xf32>
    %96 = vector.shape_cast %95 : vector<1x4xf32> to vector<1x1x4xf32>
    %97 = vector.broadcast %94 : vector<8x2x1xf32> to vector<8x2x4xf32>
    %98 = vector.broadcast %96 : vector<1x1x4xf32> to vector<8x2x4xf32>
    %99 = arith.mulf %97, %98 : vector<8x2x4xf32>
    %100 = arith.addf %93, %99 : vector<8x2x4xf32>
    %c0_34 = arith.constant 0 : index
    %c8_35 = arith.constant 8 : index
    %101 = vector.load %arg6[%c0_34, %c8_35] : memref<1x12xf32, #tpu.memory_space<vmem>>, vector<1x4xf32>
    %102 = vector.shape_cast %101 : vector<1x4xf32> to vector<1x1x4xf32>
    %103 = vector.broadcast %102 : vector<1x1x4xf32> to vector<8x2x4xf32>
    %104 = arith.addf %100, %103 : vector<8x2x4xf32>
    %105 = vector.shape_cast %42 : vector<8x2x4xf32> to vector<8x1x2x4xf32>
    %106 = vector.shape_cast %73 : vector<8x2x4xf32> to vector<1x8x2x4xf32>
    %107 = vector.broadcast %105 : vector<8x1x2x4xf32> to vector<8x8x2x4xf32>
    %108 = vector.broadcast %106 : vector<1x8x2x4xf32> to vector<8x8x2x4xf32>
    %109 = arith.mulf %107, %108 : vector<8x8x2x4xf32>
    %cst_36 = arith.constant dense<0xFF800000> : vector<8x2x4xf32>
    %110 = vector.multi_reduction <maximumf>, %109, %cst_36 [1] : vector<8x8x2x4xf32> to vector<8x2x4xf32>
    %111 = vector.shape_cast %110 : vector<8x2x4xf32> to vector<8x1x2x4xf32>
    %112 = vector.broadcast %111 : vector<8x1x2x4xf32> to vector<8x8x2x4xf32>
    %113 = arith.subf %109, %112 : vector<8x8x2x4xf32>
    %114 = math.exp %113 : vector<8x8x2x4xf32>
    %cst_37 = arith.constant dense<0.000000e+00> : vector<8x2x4xf32>
    %115 = vector.multi_reduction <add>, %114, %cst_37 [1] : vector<8x8x2x4xf32> to vector<8x2x4xf32>
    %116 = vector.shape_cast %115 : vector<8x2x4xf32> to vector<8x1x2x4xf32>
    %117 = tpu.reciprocal %116 {approx = true} : vector<8x1x2x4xf32> -> vector<8x1x2x4xf32>
    %118 = vector.broadcast %117 : vector<8x1x2x4xf32> to vector<8x8x2x4xf32>
    %119 = arith.mulf %114, %118 : vector<8x8x2x4xf32>
    %120 = vector.shape_cast %104 : vector<8x2x4xf32> to vector<1x8x2x4xf32>
    %121 = vector.broadcast %120 : vector<1x8x2x4xf32> to vector<8x8x2x4xf32>
    %122 = arith.mulf %119, %121 : vector<8x8x2x4xf32>
    %cst_38 = arith.constant dense<0.000000e+00> : vector<8x2x4xf32>
    %123 = vector.multi_reduction <add>, %122, %cst_38 [1] : vector<8x8x2x4xf32> to vector<8x2x4xf32>
    %124 = vector.extract_strided_slice %123 {offsets = [0, 0, 0], sizes = [8, 2, 1], strides = [1, 1, 1]} : vector<8x2x4xf32> to vector<8x2x1xf32>
    %c0_39 = arith.constant 0 : index
    %c0_40 = arith.constant 0 : index
    %125 = vector.load %arg7[%c0_39, %c0_40] : memref<4x4xf32, #tpu.memory_space<vmem>>, vector<1x4xf32>
    %126 = vector.shape_cast %125 : vector<1x4xf32> to vector<1x1x4xf32>
    %127 = vector.broadcast %124 : vector<8x2x1xf32> to vector<8x2x4xf32>
    %128 = vector.broadcast %126 : vector<1x1x4xf32> to vector<8x2x4xf32>
    %129 = arith.mulf %127, %128 : vector<8x2x4xf32>
    %130 = vector.extract_strided_slice %123 {offsets = [0, 0, 1], sizes = [8, 2, 1], strides = [1, 1, 1]} : vector<8x2x4xf32> to vector<8x2x1xf32>
    %c1_41 = arith.constant 1 : index
    %c0_42 = arith.constant 0 : index
    %131 = vector.load %arg7[%c1_41, %c0_42] : memref<4x4xf32, #tpu.memory_space<vmem>>, vector<1x4xf32>
    %132 = vector.shape_cast %131 : vector<1x4xf32> to vector<1x1x4xf32>
    %133 = vector.broadcast %130 : vector<8x2x1xf32> to vector<8x2x4xf32>
    %134 = vector.broadcast %132 : vector<1x1x4xf32> to vector<8x2x4xf32>
    %135 = arith.mulf %133, %134 : vector<8x2x4xf32>
    %136 = arith.addf %129, %135 : vector<8x2x4xf32>
    %137 = vector.extract_strided_slice %123 {offsets = [0, 0, 2], sizes = [8, 2, 1], strides = [1, 1, 1]} : vector<8x2x4xf32> to vector<8x2x1xf32>
    %c2_43 = arith.constant 2 : index
    %c0_44 = arith.constant 0 : index
    %138 = vector.load %arg7[%c2_43, %c0_44] : memref<4x4xf32, #tpu.memory_space<vmem>>, vector<1x4xf32>
    %139 = vector.shape_cast %138 : vector<1x4xf32> to vector<1x1x4xf32>
    %140 = vector.broadcast %137 : vector<8x2x1xf32> to vector<8x2x4xf32>
    %141 = vector.broadcast %139 : vector<1x1x4xf32> to vector<8x2x4xf32>
    %142 = arith.mulf %140, %141 : vector<8x2x4xf32>
    %143 = arith.addf %136, %142 : vector<8x2x4xf32>
    %144 = vector.extract_strided_slice %123 {offsets = [0, 0, 3], sizes = [8, 2, 1], strides = [1, 1, 1]} : vector<8x2x4xf32> to vector<8x2x1xf32>
    %c3_45 = arith.constant 3 : index
    %c0_46 = arith.constant 0 : index
    %145 = vector.load %arg7[%c3_45, %c0_46] : memref<4x4xf32, #tpu.memory_space<vmem>>, vector<1x4xf32>
    %146 = vector.shape_cast %145 : vector<1x4xf32> to vector<1x1x4xf32>
    %147 = vector.broadcast %144 : vector<8x2x1xf32> to vector<8x2x4xf32>
    %148 = vector.broadcast %146 : vector<1x1x4xf32> to vector<8x2x4xf32>
    %149 = arith.mulf %147, %148 : vector<8x2x4xf32>
    %150 = arith.addf %143, %149 : vector<8x2x4xf32>
    %c0_47 = arith.constant 0 : index
    %c0_48 = arith.constant 0 : index
    %151 = vector.load %arg8[%c0_47, %c0_48] : memref<1x4xf32, #tpu.memory_space<vmem>>, vector<1x4xf32>
    %152 = vector.shape_cast %151 : vector<1x4xf32> to vector<1x1x4xf32>
    %153 = vector.broadcast %152 : vector<1x1x4xf32> to vector<8x2x4xf32>
    %154 = arith.addf %150, %153 : vector<8x2x4xf32>
    %c0_49 = arith.constant 0 : index
    %c0_50 = arith.constant 0 : index
    %c0_51 = arith.constant 0 : index
    %155 = vector.load %arg9[%c0_49, %c0_50, %c0_51] : memref<8x2x4xf32, #tpu.memory_space<vmem>>, vector<8x2x4xf32>
    tpu.vector_store %arg9[%c0_49, %c0_50, %c0_51], %154 {strides = array<i32>} : memref<8x2x4xf32, #tpu.memory_space<vmem>>, vector<8x2x4xf32>,
    return
  }
  func.func @transform_0(%arg0: i32) -> (i32, i32, i32) {
    %c0_i32 = arith.constant 0 : i32
    %c0_i32_0 = arith.constant 0 : i32
    %c0_i32_1 = arith.constant 0 : i32
    %c0_i32_2 = arith.constant 0 : i32
    return %c0_i32, %c0_i32_0, %c0_i32_1 : i32, i32, i32
  }
  func.func @transform_1(%arg0: i32) -> (i32, i32, i32) {
    %c0_i32 = arith.constant 0 : i32
    %c0_i32_0 = arith.constant 0 : i32
    %c0_i32_1 = arith.constant 0 : i32
    %c0_i32_2 = arith.constant 0 : i32
    return %c0_i32, %c0_i32_0, %c0_i32_1 : i32, i32, i32
  }
  func.func @transform_2(%arg0: i32) -> (i32, i32, i32) {
    %c0_i32 = arith.constant 0 : i32
    %c0_i32_0 = arith.constant 0 : i32
    %c0_i32_1 = arith.constant 0 : i32
    %c0_i32_2 = arith.constant 0 : i32
    return %c0_i32, %c0_i32_0, %c0_i32_1 : i32, i32, i32
  }
  func.func @transform_3(%arg0: i32) -> (i32, i32, i32) {
    %c0_i32 = arith.constant 0 : i32
    %c0_i32_0 = arith.constant 0 : i32
    %c0_i32_1 = arith.constant 0 : i32
    %c0_i32_2 = arith.constant 0 : i32
    return %c0_i32, %c0_i32_0, %c0_i32_1 : i32, i32, i32
  }
  func.func @transform_4(%arg0: i32) -> (i32, i32) {
    %c0_i32 = arith.constant 0 : i32
    %c0_i32_0 = arith.constant 0 : i32
    %c0_i32_1 = arith.constant 0 : i32
    return %c0_i32, %c0_i32_0 : i32, i32
  }
  func.func @transform_5(%arg0: i32) -> (i32, i32) {
    %c0_i32 = arith.constant 0 : i32
    %c0_i32_0 = arith.constant 0 : i32
    %c0_i32_1 = arith.constant 0 : i32
    return %c0_i32, %c0_i32_0 : i32, i32
  }
  func.func @transform_6(%arg0: i32) -> (i32, i32) {
    %c0_i32 = arith.constant 0 : i32
    %c0_i32_0 = arith.constant 0 : i32
    %c0_i32_1 = arith.constant 0 : i32
    return %c0_i32, %c0_i32_0 : i32, i32
  }
  func.func @transform_7(%arg0: i32) -> (i32, i32) {
    %c0_i32 = arith.constant 0 : i32
    %c0_i32_0 = arith.constant 0 : i32
    %c0_i32_1 = arith.constant 0 : i32
    return %c0_i32, %c0_i32_0 : i32, i32
  }
  func.func @transform_8(%arg0: i32) -> (i32, i32, i32) {
    %c0_i32 = arith.constant 0 : i32
    %c0_i32_0 = arith.constant 0 : i32
    %c0_i32_1 = arith.constant 0 : i32
    %c0_i32_2 = arith.constant 0 : i32
    return %c0_i32, %c0_i32_0, %c0_i32_1 : i32, i32, i32
  }
}

</mosaic_0001>

<bundles_post_ra>
// kernel: tpu_custom_call.1
= control target key start
LH: loop header
LB: loop body
LE: loop exit
PB: predicated region body
PF: predicated region fallthrough
CT: control target
= control target key end

     0   :  { %v4193_v0 = vmov 1   ;;  %v4197_v1 = vmov 0   ;;  %v4195_v27 = vmov 2   ;;  %v4199_v34 = vmov 3   ;;  %s4184_s0 = inlined_call_operand.vmem [shape: f32[1,2,4], index: 0, kind: input, shape index: {}]   ;;  %s4185_s1 = inlined_call_operand.vmem [shape: f32[8,2,4], index: 1, kind: input, shape index: {}]   ;;  %s4186_s2 = inlined_call_operand.vmem [shape: f32[8,2,4], index: 2, kind: input, shape index: {}]   ;;  %s4187_s3 = inlined_call_operand.vmem [shape: f32[8,2,4], index: 3, kind: input, shape index: {}]   ;;  %s4188_s4 = inlined_call_operand.vmem [shape: f32[4,12], index: 4, kind: input, shape index: {}]   ;;  %s4189_s5 = inlined_call_operand.vmem [shape: f32[1,12], index: 5, kind: input, shape index: {}]   ;;  %s4190_s6 = inlined_call_operand.vmem [shape: f32[4,4], index: 6, kind: input, shape index: {}]   ;;  %s4191_s7 = inlined_call_operand.vmem [shape: f32[1,4], index: 7, kind: input, shape index: {}]   ;;  %s4192_s8 = inlined_call_operand.vmem [shape: f32[8,2,4], index: 8, kind: output, shape index: {}]  }
   0x1   :  { %1778 = vset.pattern.permute.xlu0 %v4193_v0  ;;  %1777 = vset.pattern.permute.xlu1 %v4197_v1  ;;  %v2007_v2 = vld [vmem:[%s4184_s0] sm:$0x3]  ;;  %v32_v3 = vld [vmem:[%s4185_s1 + $0x4] sm:$0x3]  ;;  %v33_v7 = vld [vmem:[%s4185_s1 + $0x6] sm:$0x3] }
   0x2   :  { %v30_v4 = vld [vmem:[%s4185_s1] sm:$0x3]  ;;  %v2016_v5 = vmul.f32 %v32_v3, %v2007_v2  ;;  %v41_v8 = vmul.f32 %v33_v7, %v2007_v2  ;;  %v35_v9 = vld [vmem:[%s4185_s1 + $0xa] sm:$0x3]  ;;  %v37_v11 = vld [vmem:[%s4185_s1 + $0xe] sm:$0x3] }
   0x3   :  { %v2019_v6 = vmul.f32 %v30_v4, %v2007_v2  ;;  %v43_v10 = vmul.f32 %v35_v9, %v2007_v2  ;;  %v45_v12 = vmul.f32 %v37_v11, %v2007_v2  ;;  %v46_v13 = vld [vmem:[%s4186_s2] sm:$0x3]  ;;  %v31_v14 = vld [vmem:[%s4185_s1 + $0x2] sm:$0x3]  ;;  %v49_v17 = vld [vmem:[%s4186_s2 + $0x6] sm:$0x3] }
   0x4   :  { %91 = vperm.xlu1 %1777, %v2016_v5   ;;  %v2042_v15 = vmul.f32 %v46_v13, %v2007_v2  ;;  %v2045_v16 = vmul.f32 %v31_v14, %v2007_v2  ;;  %v2053_v18 = vmul.f32 %v49_v17, %v2007_v2  ;;  %v51_v19 = vld [vmem:[%s4186_s2 + $0xa] sm:$0x3]  ;;  %v34_v20 = vld [vmem:[%s4185_s1 + $0x8] sm:$0x3]  ;;  %v53_v23 = vld [vmem:[%s4186_s2 + $0xe] sm:$0x3] }
   0x5   :  { %133 = vperm.xlu0 %1778, %v2019_v6   ;;  %v2064_v21 = vmul.f32 %v51_v19, %v2007_v2  ;;  %v42_v22 = vmul.f32 %v34_v20, %v2007_v2  ;;  %v36_v24 = vld [vmem:[%s4185_s1 + $0xc] sm:$0x3]  ;;  %v2076_v25 = vmul.f32 %v53_v23, %v2007_v2  ;;  %v47_v28 = vld [vmem:[%s4186_s2 + $0x2] sm:$0x3]  ;;  %v50_v30 = vld [vmem:[%s4186_s2 + $0x8] sm:$0x3] }
   0x6   :  { %v44_v26 = vmul.f32 %v36_v24, %v2007_v2  ;;  %v2089_v29 = vmul.f32 %v47_v28, %v2007_v2  ;;  %v2096_v31 = vmul.f32 %v50_v30, %v2007_v2  ;;  %v52_v32 = vld [vmem:[%s4186_s2 + $0xc] sm:$0x3]  ;;  %v48_v35 = vld [vmem:[%s4186_s2 + $0x4] sm:$0x3]  ;;  %v63_v37 = vld [vmem:[%s4187_s3 + $0x2] sm:$0x3] }
   0x7   :  { %v2103_v33 = vmul.f32 %v52_v32, %v2007_v2  ;;  %v56_v36 = vmul.f32 %v48_v35, %v2007_v2  ;;  %v2140_v38 = vmul.f32 %v63_v37, %v2007_v2  ;;  %v66_v39 = vld [vmem:[%s4187_s3 + $0x8] sm:$0x3]  ;;  %v68_v41 = vld [vmem:[%s4187_s3 + $0xc] sm:$0x3]  ;;  %v62_v47 = vld [vmem:[%s4187_s3] sm:$0x3] }
   0x8   :  { %96 = vperm.xlu1 %1777, %v41_v8   ;;  %v2148_v40 = vmul.f32 %v66_v39, %v2007_v2  ;;  %v2160_v44 = vmul.f32 %v68_v41, %v2007_v2  ;;  %v2173_v48 = vmul.f32 %v62_v47, %v2007_v2  ;;  %v65_v51 = vld [vmem:[%s4187_s3 + $0x6] sm:$0x3]  ;;  %v67_v55 = vld [vmem:[%s4187_s3 + $0xa] sm:$0x3]  ;;  %v69_v58 = vld [vmem:[%s4187_s3 + $0xe] sm:$0x3] }
   0x9   :  { %145 = vperm.xlu0 %1778, %v41_v8   ;;  %v2186_v52 = vmul.f32 %v65_v51, %v2007_v2  ;;  %v2197_v56 = vmul.f32 %v67_v55, %v2007_v2  ;;  %v2209_v60 = vmul.f32 %v69_v58, %v2007_v2  ;;  %v64_v63 = vld [vmem:[%s4187_s3 + $0x4] sm:$0x3]  ;;  %v2302_v55 = vld [vmem:[%s4188_s4] ss:$0 sm:$0xff]  ;;  %s1955_s2 = smov 124   ;;  %vm801_vm0 = vcmask 25600  }
   0xc   :  { %106 = vperm.xlu1 %1777, %v43_v10  }
   0xd   :  { %153 = vperm.xlu0 %1778, %v43_v10  }
  0x10   :  { %116 = vperm.xlu1 %1777, %v45_v12  }
  0x11   :  { %161 = vperm.xlu0 %1778, %v45_v12  }
  0x14   :  { %1779 = vset.pattern.permute.xlu1 %v4193_v0 }
  0x15   :  { %354 = vperm.xlu0 %1778, %v2042_v15   ;;  %137 = vperm.xlu1 %1779, %v2045_v16  }
  0x19   :  { %366 = vperm.xlu0 %1778, %v2053_v18   ;;  %141 = vperm.xlu1 %1779, %v2016_v5  }
  0x1d   :  { %374 = vperm.xlu0 %1778, %v2064_v21   ;;  %149 = vperm.xlu1 %1779, %v42_v22  }
  0x21   :  { %382 = vperm.xlu0 %1778, %v2076_v25   ;;  %157 = vperm.xlu1 %1779, %v44_v26  }
  0x25   :  { %1784 = vset.pattern.permute.xlu0 %v4195_v27  ;;  %1780 = vset.pattern.permute.xlu1 %v4195_v27 }
  0x26   :  { %190 = vperm.xlu0 %1784, %v2045_v16   ;;  %186 = vperm.xlu1 %1780, %v2019_v6  }
  0x2a   :  { %202 = vperm.xlu0 %1784, %v42_v22   ;;  %194 = vperm.xlu1 %1780, %v2016_v5  }
  0x2e   :  { %210 = vperm.xlu0 %1784, %v44_v26   ;;  %198 = vperm.xlu1 %1780, %v41_v8  }
  0x32   :  { %406 = vperm.xlu0 %1784, %v2089_v29   ;;  %206 = vperm.xlu1 %1780, %v43_v10  }
  0x36   :  { %418 = vperm.xlu0 %1784, %v2096_v31   ;;  %214 = vperm.xlu1 %1780, %v45_v12  }
  0x3a   :  { %426 = vperm.xlu0 %1784, %v2103_v33   ;;  %1781 = vset.pattern.permute.xlu1 %v4199_v34 }
  0x3b   :  { %243 = vperm.xlu1 %1781, %v2045_v16  }
  0x3e   :  { %1786 = vset.pattern.permute.xlu0 %v4199_v34 }
  0x3f   :  { %239 = vperm.xlu0 %1786, %v2019_v6   ;;  %247 = vperm.xlu1 %1781, %v2016_v5   ;;  %v72_v5 = vmul.f32 %v64_v63, %v2007_v2  ;;  %v2308_v63 = vld [vmem:[%s4188_s4 + $0x1] ss:$0 sm:$0xff] }
  0x43   :  { %251 = vperm.xlu0 %1786, %v41_v8   ;;  %255 = vperm.xlu1 %1781, %v42_v22  }
  0x47   :  { %259 = vperm.xlu0 %1786, %v43_v10   ;;  %263 = vperm.xlu1 %1781, %v44_v26  }
  0x4b   :  { %267 = vperm.xlu0 %1786, %v45_v12   ;;  %1782 = vset.pattern.permute.xlu1 %v4197_v1 }
  0x4c   :  { %307 = vperm.xlu1 %1782, %v2042_v15  }
  0x4f   :  { %450 = vperm.xlu0 %1786, %v2042_v15  }
  0x50   :  { %317 = vperm.xlu1 %1782, %v56_v36  }
  0x53   :  { %462 = vperm.xlu0 %1786, %v2053_v18  }
  0x54   :  { %322 = vperm.xlu1 %1782, %v2053_v18  }
  0x57   :  { %470 = vperm.xlu0 %1786, %v2064_v21  }
  0x58   :  { %332 = vperm.xlu1 %1782, %v2064_v21  }
  0x5b   :  { %478 = vperm.xlu0 %1786, %v2076_v25  }
  0x5c   :  { %342 = vperm.xlu1 %1782, %v2076_v25  }
  0x5f   :  { %1788 = vset.pattern.permute.xlu0 %v4197_v1 }
  0x60   :  { %81 = vperm.xlu0 %1788, %v2019_v6   ;;  %1783 = vset.pattern.permute.xlu1 %v4193_v0 }
  0x61   :  { %358 = vperm.xlu1 %1783, %v2089_v29  }
  0x64   :  { %86 = vperm.xlu0 %1788, %v2045_v16  }
  0x65   :  { %362 = vperm.xlu1 %1783, %v56_v36  }
  0x68   :  { %101 = vperm.xlu0 %1788, %v42_v22  }
  0x69   :  { %370 = vperm.xlu1 %1783, %v2096_v31  }
  0x6c   :  { %111 = vperm.xlu0 %1788, %v44_v26  }
  0x6d   :  { %378 = vperm.xlu1 %1783, %v2103_v33  }
  0x70   :  { %312 = vperm.xlu0 %1788, %v2089_v29  }
  0x71   :  { %1785 = vset.pattern.permute.xlu1 %v4195_v27 }
  0x72   :  { %402 = vperm.xlu1 %1785, %v2042_v15  }
  0x74   :  { %327 = vperm.xlu0 %1788, %v2096_v31  }
  0x76   :  { %410 = vperm.xlu1 %1785, %v56_v36  }
  0x78   :  { %337 = vperm.xlu0 %1788, %v2103_v33  }
  0x7a   :  { %414 = vperm.xlu1 %1785, %v2053_v18  }
  0x7c   :  { %512 = vperm.xlu0 %1788, %v2140_v38  }
  0x7e   :  { %422 = vperm.xlu1 %1785, %v2064_v21  }
  0x7f   :  { %v2154_v42 = vpop.permute.xlu1 %91 }
  0x80   :  { %4318 = vst [vmem:[#allocation2_spill] sm:$0xff] %v2154_v42  ;;  %527 = vperm.xlu0 %1788, %v2148_v40   ;;  %v2157_v43 = vpop.permute.xlu0 %133 }
  0x82   :  { %430 = vperm.xlu1 %1785, %v2076_v25  }
  0x83   :  { %v2163_v45 = vpop.permute.xlu1 %96 }
  0x84   :  { %537 = vperm.xlu0 %1788, %v2160_v44   ;;  %v2166_v46 = vpop.permute.xlu0 %145 }
  0x86   :  { %1787 = vset.pattern.permute.xlu1 %v4199_v34 }
  0x87   :  { %v2175_v49 = vpop.permute.xlu1 %106  ;;  %454 = vperm.xlu1 %1787, %v2089_v29  }
  0x88   :  { %v2178_v50 = vpop.permute.xlu0 %153  ;;  %1790 = vset.pattern.permute.xlu0 %v4193_v0 }
  0x89   :  { %554 = vperm.xlu0 %1790, %v2173_v48  }
  0x8b   :  { %v2188_v53 = vpop.permute.xlu1 %116  ;;  %458 = vperm.xlu1 %1787, %v56_v36  }
  0x8c   :  { %v2190_v54 = vpop.permute.xlu0 %161 }
  0x8d   :  { %566 = vperm.xlu0 %1790, %v2186_v52  }
  0x8f   :  { %466 = vperm.xlu1 %1787, %v2096_v31  }
  0x90   :  { %v2200_v57 = vpop.permute.xlu0 %354  ;;  %v2205_v59 = vpop.permute.xlu1 %137 }
  0x91   :  { %574 = vperm.xlu0 %1790, %v2197_v56  }
  0x93   :  { %474 = vperm.xlu1 %1787, %v2103_v33  }
  0x94   :  { %v2212_v61 = vpop.permute.xlu0 %366  ;;  %v2214_v62 = vpop.permute.xlu1 %141 }
  0x95   :  { %4319 = vst [vmem:[#allocation3_spill] sm:$0xff] %v2214_v62  ;;  %582 = vperm.xlu0 %1790, %v2209_v60  }
  0x97   :  { %1789 = vset.pattern.permute.xlu1 %v4197_v1 }
  0x98   :  { %v2221_v3 = vpop.permute.xlu0 %374  ;;  %v2223_v4 = vpop.permute.xlu1 %149  ;;  %507 = vperm.xlu1 %1789, %v2173_v48  }
  0x99   :  { %1793 = vset.pattern.permute.xlu0 %v4195_v27 }
  0x9a   :  { %606 = vperm.xlu0 %1793, %v2140_v38  }
  0x9c   :  { %v2229_v6 = vpop.permute.xlu0 %382  ;;  %v2231_v7 = vpop.permute.xlu1 %157  ;;  %517 = vperm.xlu1 %1789, %v72_v5  }
  0xa0   :  { %522 = vperm.xlu1 %1789, %v2186_v52  }
  0xa1   :  { %v2234_v8 = vpop.permute.xlu0 %190  ;;  %v2236_v9 = vpop.permute.xlu1 %186 }
  0xa4   :  { %532 = vperm.xlu1 %1789, %v2197_v56  }
  0xa5   :  { %v2239_v10 = vpop.permute.xlu0 %202  ;;  %v2241_v2 = vpop.permute.xlu1 %194 }
  0xa6   :  { %4320 = vst [vmem:[#allocation4_spill] sm:$0xff] %v2241_v2 }
  0xa8   :  { %542 = vperm.xlu1 %1789, %v2209_v60  }
  0xa9   :  { %v2244_v11 = vpop.permute.xlu0 %210  ;;  %v2246_v12 = vpop.permute.xlu1 %198 }
  0xac   :  { %1791 = vset.pattern.permute.xlu1 %v4193_v0 }
  0xad   :  { %v2249_v13 = vpop.permute.xlu0 %406  ;;  %558 = vperm.xlu1 %1791, %v2140_v38   ;;  %v2252_v14 = vpop.permute.xlu1 %206 }
  0xb1   :  { %v2254_v15 = vpop.permute.xlu0 %418  ;;  %562 = vperm.xlu1 %1791, %v72_v5   ;;  %v2256_v16 = vpop.permute.xlu1 %214 }
  0xb5   :  { %v2258_v17 = vpop.permute.xlu0 %426  ;;  %570 = vperm.xlu1 %1791, %v2148_v40  }
  0xb6   :  { %v2261_v18 = vpop.permute.xlu1 %243 }
  0xb7   :  { %4321 = vst [vmem:[#allocation5_spill] sm:$0xff] %v2261_v18 }
  0xb9   :  { %578 = vperm.xlu1 %1791, %v2160_v44  }
  0xba   :  { %v2264_v19 = vpop.permute.xlu0 %239  ;;  %v2266_v20 = vpop.permute.xlu1 %247 }
  0xbb   :  { %4322 = vst [vmem:[#allocation6_spill] sm:$0xff] %v2264_v19  ;;  %4323 = vst [vmem:[#allocation7_spill] sm:$0xff] %v2266_v20 }
  0xbd   :  { %1792 = vset.pattern.permute.xlu1 %v4195_v27 }
  0xbe   :  { %v2269_v21 = vpop.permute.xlu0 %251  ;;  %602 = vperm.xlu1 %1792, %v2173_v48   ;;  %v2272_v22 = vpop.permute.xlu1 %255 }
  0xbf   :  { %4324 = vst [vmem:[#allocation8_spill] sm:$0xff] %v2269_v21  ;;  %4325 = vst [vmem:[#allocation9_spill] sm:$0xff] %v2272_v22  ;;  %v2331_v22 = vld [vmem:[%s4189_s5] ss:$0 sm:$0xff]  ;;  %v4329_v21 = vmov 3  }
  0xc2   :  { %v2274_v23 = vpop.permute.xlu0 %259  ;;  %610 = vperm.xlu1 %1792, %v72_v5   ;;  %v2276_v24 = vpop.permute.xlu1 %263 }
  0xc3   :  { %4326 = vst [vmem:[#allocation10_spill] sm:$0xff] %v2274_v23  ;;  %4327 = vst [vmem:[#allocation11_spill] sm:$0xff] %v2276_v24 }
  0xc6   :  { %v2278_v25 = vpop.permute.xlu0 %267  ;;  %1794 = vset.pattern.permute.xlu1 %v4199_v34 }
  0xc7   :  { %4328 = vst [vmem:[#allocation12_spill] sm:$0xff] %v2278_v25  ;;  %650 = vperm.xlu1 %1794, %v2173_v48   ;;  %v308_v26 = vpop.permute.xlu1 %307 }
  0xc8   :  { %v345_v58 = vmul.f32 %v2302_v55, %v308_v26  ;;  %v2323_v26 = vld [vmem:[%s4188_s4 + $0x3] ss:$0 sm:$0xff] }
  0xca   :  { %v451_v28 = vpop.permute.xlu0 %450 }
  0xcb   :  { %1795 = vset.pattern.permute.xlu1 %v4195_v27  ;;  %v318_v29 = vpop.permute.xlu1 %317  ;;  %v2317_v27 = vld [vmem:[%s4188_s4 + $0x2] ss:$0 sm:$0xff]  ;;  %v481_v2 = vmul.f32 %v2323_v26, %v451_v28  ;;  %s1956_s4 = smov 120  }
  0xcc   :  { %614 = vperm.xlu1 %1795, %v2186_v52  }
  0xce   :  { %v463_v30 = vpop.permute.xlu0 %462 }
  0xcf   :  { %v323_v31 = vpop.permute.xlu1 %322 }
  0xd0   :  { %1796 = vset.pattern.permute.xlu1 %v4199_v34 }
  0xd1   :  { %658 = vperm.xlu1 %1796, %v72_v5   ;;  %v385_v5 = vmul.f32 %v2308_v63, %v2200_v57 }
  0xd2   :  { %v2287_v33 = vpop.permute.xlu0 %470 }
  0xd3   :  { %v2285_v32 = vpop.permute.xlu1 %332  ;;  %v393_v34 = vadd.f32 %v385_v5, %v345_v58  ;;  %v348_v5 = vmul.f32 %v2302_v55, %v323_v31  ;;  %v484_v31 = vmul.f32 %v2323_v26, %v463_v30 }
  0xd6   :  { %v2289_v36 = vpop.permute.xlu0 %478 }
  0xd7   :  { %v343_v35 = vpop.permute.xlu1 %342 }
  0xdb   :  { %v2291_v39 = vpop.permute.xlu0 %81 }
  0xdc   :  { %v359_v37 = vpop.permute.xlu1 %358 }
  0xdf   :  { %v2295_v48 = vpop.permute.xlu0 %86 }
  0xe0   :  { %v363_v41 = vpop.permute.xlu1 %362 }
  0xe3   :  { %v2312_v0 = vpop.permute.xlu0 %101 }
  0xe4   :  { %v2293_v47 = vpop.permute.xlu1 %370 }
  0xe7   :  { %v2326_v42 = vpop.permute.xlu0 %111 }
  0xe8   :  { %v2297_v51 = vpop.permute.xlu1 %378 }
  0xeb   :  { %v313_v19 = vpop.permute.xlu0 %312 }
  0xec   :  { %v346_v28 = vmul.f32 %v2302_v55, %v313_v19 }
  0xed   :  { %v403_v1 = vpop.permute.xlu1 %402 }
  0xee   :  { %v433_v20 = vmul.f32 %v2317_v27, %v403_v1 }
  0xf0   :  { %v441_v62 = vadd.f32 %v433_v20, %v393_v34  ;;  %v388_v34 = vmul.f32 %v2308_v63, %v2212_v61  ;;  %v434_v61 = vmul.f32 %v2317_v27, %v2249_v13  ;;  %v352_v13 = vmul.f32 %v2302_v55, %v343_v35 }
  0xf1   :  { %v411_v57 = vpop.permute.xlu1 %410 }
  0xf2   :  { %v489_v24 = vadd.f32 %v481_v2, %v441_v62  ;;  %v396_v2 = vadd.f32 %v388_v34, %v348_v5  ;;  %v387_v5 = vmul.f32 %v2308_v63, %v363_v41 }
  0xf4   :  { %v497_v58 = vadd.f32 %v2331_v22, %v489_v24  ;;  %v386_v24 = vmul.f32 %v2308_v63, %v359_v37  ;;  %v347_v37 = vmul.f32 %v2302_v55, %v318_v29 }
  0xf5   :  { %v415_v1 = vpop.permute.xlu1 %414 }
  0xf6   :  { %713 = vrot.lane.b32.xlu0 %v497_v58, %s1955_s2  ;;  %v436_v20 = vmul.f32 %v2317_v27, %v415_v1  ;;  %v394_v58 = vadd.f32 %v386_v24, %v346_v28 }
  0xf8   :  { %v444_v18 = vadd.f32 %v436_v20, %v396_v2  ;;  %v442_v34 = vadd.f32 %v434_v61, %v394_v58  ;;  %v435_v20 = vmul.f32 %v2317_v27, %v411_v57  ;;  %v328_v58 = vpop.permute.xlu0 %327 }
  0xf9   :  { %v423_v62 = vpop.permute.xlu1 %422 }
  0xfa   :  { %618 = vperm.xlu0 %1793, %v2148_v40   ;;  %v492_v23 = vadd.f32 %v484_v31, %v444_v18  ;;  %v395_v18 = vadd.f32 %v387_v5, %v347_v37  ;;  %v488_v5 = vmul.f32 %v2323_v26, %v2289_v36  ;;  %v437_v37 = vmul.f32 %v2317_v27, %v2254_v15 }
  0xfc   :  { %v500_v2 = vadd.f32 %v2331_v22, %v492_v23  ;;  %v443_v31 = vadd.f32 %v435_v20, %v395_v18  ;;  %v438_v18 = vmul.f32 %v2317_v27, %v423_v62 }
  0xfd   :  { %v431_v25 = vpop.permute.xlu1 %430 }
  0xfe   :  { %622 = vperm.xlu0 %1793, %v2197_v56   ;;  %v440_v29 = vmul.f32 %v2317_v27, %v431_v25  ;;  %v389_v25 = vmul.f32 %v2308_v63, %v2293_v47 }
 0x102   :  { %v455_v1 = vpop.permute.xlu1 %454  ;;  %1797 = vset.pattern.permute.xlu0 %v4329_v21 }
 0x103   :  { %v482_v19 = vmul.f32 %v2323_v26, %v455_v1  ;;  %654 = vperm.xlu0 %1797, %v2140_v38   ;;  %v392_v38 = vmul.f32 %v2308_v63, %v2229_v6  ;;  %v349_v1 = vmul.f32 %v2302_v55, %v328_v58  ;;  %v439_v58 = vmul.f32 %v2317_v27, %v2258_v17 }
 0x105   :  { %v490_v30 = vadd.f32 %v482_v19, %v442_v34  ;;  %v400_v23 = vadd.f32 %v392_v38, %v352_v13  ;;  %v390_v13 = vmul.f32 %v2308_v63, %v2221_v3  ;;  %v486_v3 = vmul.f32 %v2323_v26, %v2287_v33 }
 0x106   :  { %v459_v28 = vpop.permute.xlu1 %458 }
 0x107   :  { %v498_v24 = vadd.f32 %v2331_v22, %v490_v30  ;;  %v483_v41 = vmul.f32 %v2323_v26, %v459_v28  ;;  %719 = vrot.lane.b32.xlu0 %v500_v2, %s1955_s2  ;;  %v448_v35 = vadd.f32 %v440_v29, %v400_v23  ;;  %v350_v30 = vmul.f32 %v2302_v55, %v2285_v32  ;;  %v338_v2 = vpop.permute.xlu0 %337 }
 0x108   :  { %v351_v38 = vmul.f32 %v2302_v55, %v338_v2 }
 0x109   :  { %715 = vrot.lane.b32.xlu1 %v498_v24, %s1955_s2  ;;  %v491_v61 = vadd.f32 %v483_v41, %v443_v31  ;;  %v496_v19 = vadd.f32 %v488_v5, %v448_v35  ;;  %v4330_v24 = vmov 0   ;;  %v4331_v41 = vmov 2  }
 0x10a   :  { %v467_v57 = vpop.permute.xlu1 %466  ;;  %v391_v31 = vmul.f32 %v2308_v63, %v2297_v51 }
 0x10b   :  { %670 = vperm.xlu0 %1797, %v2197_v56   ;;  %v499_v6 = vadd.f32 %v2331_v22, %v491_v61  ;;  %v397_v56 = vadd.f32 %v389_v25, %v349_v1  ;;  %v485_v36 = vmul.f32 %v2323_v26, %v467_v57  ;;  %v504_v20 = vadd.f32 %v2331_v22, %v496_v19  ;;  %v513_v33 = vpop.permute.xlu0 %512 }
 0x10c   :  { %v399_v62 = vadd.f32 %v391_v31, %v351_v38  ;;  %v546_v17 = vmul.f32 %v2302_v55, %v513_v33 }
 0x10d   :  { %662 = vperm.xlu1 %1796, %v2186_v52   ;;  %v445_v47 = vadd.f32 %v437_v37, %v397_v56 }
 0x10e   :  { %v475_v34 = vpop.permute.xlu1 %474  ;;  %v447_v35 = vadd.f32 %v439_v58, %v399_v62 }
 0x10f   :  { %674 = vperm.xlu0 %1797, %v2160_v44   ;;  %v493_v15 = vadd.f32 %v485_v36, %v445_v47  ;;  %v528_v19 = vpop.permute.xlu0 %527 }
 0x110   :  { %v549_v36 = vmul.f32 %v2302_v55, %v528_v19 }
 0x111   :  { %717 = vrot.lane.b32.xlu1 %v499_v6, %s1955_s2  ;;  %v501_v57 = vadd.f32 %v2331_v22, %v493_v15 }
 0x113   :  { %678 = vperm.xlu0 %1797, %v2209_v60   ;;  %v508_v52 = vpop.permute.xlu1 %507 }
 0x115   :  { %666 = vperm.xlu1 %1796, %v2148_v40   ;;  %v398_v40 = vadd.f32 %v390_v13, %v350_v30  ;;  %v538_v30 = vpop.permute.xlu0 %537 }
 0x116   :  { %v551_v13 = vmul.f32 %v2302_v55, %v538_v30 }
 0x117   :  { %727 = vrot.lane.b32.xlu0 %v504_v20, %s1955_s2  ;;  %v518_v28 = vpop.permute.xlu1 %517  ;;  %v446_v29 = vadd.f32 %v438_v18, %v398_v40  ;;  %v545_v40 = vmul.f32 %v2302_v55, %v508_v52 }
 0x118   :  { %1800 = vset.pattern.permute.xlu0 %v4330_v24 }
 0x119   :  { %1798 = vset.pattern.permute.xlu1 %v4331_v41  ;;  %v494_v61 = vadd.f32 %v486_v3, %v446_v29 }
 0x11a   :  { %626 = vperm.xlu1 %1798, %v2160_v44   ;;  %v487_v44 = vmul.f32 %v2323_v26, %v475_v34 }
 0x11b   :  { %v523_v32 = vpop.permute.xlu1 %522  ;;  %v502_v5 = vadd.f32 %v2331_v22, %v494_v61 }
 0x11c   :  { %v495_v1 = vadd.f32 %v487_v44, %v447_v35  ;;  %v548_v61 = vmul.f32 %v2302_v55, %v523_v32 }
 0x11e   :  { %721 = vrot.lane.b32.xlu1 %v501_v57, %s1955_s2  ;;  %v503_v6 = vadd.f32 %v2331_v22, %v495_v1  ;;  %v547_v1 = vmul.f32 %v2302_v55, %v518_v28 }
 0x11f   :  { %v2393_v23 = vpop.permute.xlu1 %532 }
 0x122   :  { %630 = vperm.xlu1 %1798, %v2209_v60  }
 0x123   :  { %v2399_v51 = vpop.permute.xlu1 %542 }
 0x124   :  { %v552_v21 = vmul.f32 %v2302_v55, %v2399_v51 }
 0x126   :  { %723 = vrot.lane.b32.xlu1 %v502_v5, %s1955_s2 }
 0x127   :  { %1799 = vset.pattern.permute.xlu1 %v4330_v24  ;;  %v555_v24 = vpop.permute.xlu0 %554 }
 0x128   :  { %v559_v25 = vpop.permute.xlu1 %558  ;;  %v585_v38 = vmul.f32 %v2308_v63, %v555_v24  ;;  %v171_v24 = vmul.f32 %v2308_v63, %v2166_v46  ;;  %v169_v46 = vmul.f32 %v2308_v63, %v2205_v59  ;;  %v222_v59 = vmul.f32 %v2317_v27, %v2234_v8 }
 0x129   :  { %v586_v34 = vmul.f32 %v2308_v63, %v559_v25 }
 0x12a   :  { %725 = vrot.lane.b32.xlu1 %v503_v6, %s1955_s2  ;;  %v593_v29 = vadd.f32 %v585_v38, %v545_v40  ;;  %v127_v40 = vmul.f32 %v2302_v55, %v2312_v0  ;;  %v129_v38 = vmul.f32 %v2302_v55, %v2326_v42  ;;  %v172_v0 = vmul.f32 %v2308_v63, %v2223_v4 }
 0x12b   :  { %v2408_v60 = vadd.f32 %v586_v34, %v546_v17  ;;  %v567_v62 = vpop.permute.xlu0 %566  ;;  %v174_v42 = vmul.f32 %v2308_v63, %v2231_v7  ;;  %v221_v4 = vmul.f32 %v2317_v27, %v2236_v9  ;;  %v224_v7 = vmul.f32 %v2317_v27, %v2246_v12 }
 0x12c   :  { %v563_v56 = vpop.permute.xlu1 %562  ;;  %v588_v44 = vmul.f32 %v2308_v63, %v567_v62  ;;  %v180_v62 = vadd.f32 %v172_v0, %v127_v40  ;;  %v4340_v0 = vld [vmem:[#allocation3_spill] sm:$0xff] }
 0x12d   :  { %v587_v5 = vmul.f32 %v2308_v63, %v563_v56 }
 0x12e   :  { %v596_v6 = vadd.f32 %v588_v44, %v548_v61  ;;  %v226_v61 = vmul.f32 %v2317_v27, %v2252_v14  ;;  %v228_v44 = vmul.f32 %v2317_v27, %v2256_v16 }
 0x12f   :  { %v595_v25 = vadd.f32 %v587_v5, %v547_v1  ;;  %v4332_v1 = vld [vmem:[#allocation8_spill] sm:$0xff] }
 0x130   :  { %v571_v37 = vpop.permute.xlu1 %570  ;;  %v277_v9 = vmul.f32 %v2323_v26, %v4332_v1 }
 0x131   :  { %v589_v20 = vmul.f32 %v2308_v63, %v571_v37 }
 0x133   :  { %v2412_v47 = vadd.f32 %v589_v20, %v549_v36 }
 0x134   :  { %v579_v2 = vpop.permute.xlu1 %578 }
 0x135   :  { %v591_v18 = vmul.f32 %v2308_v63, %v579_v2  ;;  %v123_v2 = vmul.f32 %v2302_v55, %v2291_v39  ;;  %v168_v39 = vmul.f32 %v2308_v63, %v2157_v43  ;;  %v175_v43 = vmul.f32 %v2308_v63, %v2190_v54 }
 0x136   :  { %v227_v54 = vmul.f32 %v2317_v27, %v2244_v11 }
 0x137   :  { %v2416_v15 = vadd.f32 %v591_v18, %v551_v13  ;;  %v124_v13 = vmul.f32 %v2302_v55, %v2295_v48  ;;  %v126_v18 = vmul.f32 %v2302_v55, %v2163_v45  ;;  %v128_v48 = vmul.f32 %v2302_v55, %v2175_v49 }
 0x138   :  { %v173_v45 = vmul.f32 %v2308_v63, %v2178_v50  ;;  %v182_v50 = vadd.f32 %v174_v42, %v129_v38  ;;  %v170_v42 = vmul.f32 %v2308_v63, %v4340_v0 }
 0x139   :  { %v603_v31 = vpop.permute.xlu1 %602  ;;  %v177_v49 = vadd.f32 %v169_v46, %v124_v13 }
 0x13a   :  { %v633_v57 = vmul.f32 %v2317_v27, %v603_v31  ;;  %v2447_v31 = vpop.permute.xlu0 %574 }
 0x13b   :  { %v230_v12 = vadd.f32 %v222_v59, %v177_v49  ;;  %v4341_v59 = vld [vmem:[#allocation4_spill] sm:$0xff] }
 0x13c   :  { %v641_v58 = vadd.f32 %v633_v57, %v593_v29  ;;  %v130_v29 = vmul.f32 %v2302_v55, %v2188_v53  ;;  %v176_v57 = vadd.f32 %v168_v39, %v123_v2  ;;  %v225_v53 = vmul.f32 %v2317_v27, %v2239_v10 }
 0x13d   :  { %v611_v3 = vpop.permute.xlu1 %610 }
 0x13e   :  { %v635_v17 = vmul.f32 %v2317_v27, %v611_v3  ;;  %v179_v3 = vadd.f32 %v171_v24, %v126_v18  ;;  %v183_v8 = vadd.f32 %v175_v43, %v130_v29  ;;  %v229_v5 = vadd.f32 %v221_v4, %v176_v57 }
 0x13f   :  { %v223_v4 = vmul.f32 %v2317_v27, %v4341_v59 }
 0x140   :  { %v643_v28 = vadd.f32 %v635_v17, %v595_v25  ;;  %v235_v25 = vadd.f32 %v227_v54, %v182_v50  ;;  %v232_v14 = vadd.f32 %v224_v7, %v179_v3  ;;  %v4335_v17 = vld [vmem:[#allocation5_spill] sm:$0xff] }
 0x141   :  { %v275_v16 = vmul.f32 %v2323_v26, %v4335_v17 }
 0x142   :  { %v651_v35 = vpop.permute.xlu1 %650  ;;  %v285_v2 = vadd.f32 %v277_v9, %v232_v14 }
 0x143   :  { %v681_v52 = vmul.f32 %v2323_v26, %v651_v35  ;;  %v2479_v35 = vpop.permute.xlu0 %582  ;;  %v283_v18 = vadd.f32 %v275_v16, %v230_v12 }
 0x144   :  { %v2500_v29 = vadd.f32 %v2331_v22, %v285_v2 }
 0x145   :  { %v689_v33 = vadd.f32 %v681_v52, %v641_v58  ;;  %v181_v58 = vadd.f32 %v173_v45, %v128_v48  ;;  %v4333_v52 = vld [vmem:[#allocation10_spill] sm:$0xff]  ;;  %v2506_v57 = vadd.f32 %v2331_v22, %v283_v18 }
 0x146   :  { %v279_v10 = vmul.f32 %v2323_v26, %v4333_v52  ;;  %v4339_v45 = vld [vmem:[#allocation2_spill] sm:$0xff] }
 0x147   :  { %v697_v34 = vadd.f32 %v2331_v22, %v689_v33  ;;  %v615_v19 = vpop.permute.xlu1 %614  ;;  %v4334_v33 = vld [vmem:[#allocation12_spill] sm:$0xff]  ;;  %v607_v48 = vpop.permute.xlu0 %606  ;;  %v125_v46 = vmul.f32 %v2302_v55, %v4339_v45 }
 0x148   :  { %v636_v37 = vmul.f32 %v2317_v27, %v615_v19  ;;  %v281_v11 = vmul.f32 %v2323_v26, %v4334_v33  ;;  %v634_v14 = vmul.f32 %v2317_v27, %v607_v48 }
 0x149   :  { %1314 = vrot.lane.b32.xlu1 %v697_v34, %s1956_s4  ;;  %v4336_v34 = vld [vmem:[#allocation6_spill] sm:$0xff]  ;;  %v178_v9 = vadd.f32 %v170_v42, %v125_v46 }
 0x14a   :  { %v2430_v32 = vadd.f32 %v636_v37, %v596_v6  ;;  %v233_v6 = vadd.f32 %v225_v53, %v180_v62  ;;  %v274_v19 = vmul.f32 %v2323_v26, %v4336_v34  ;;  %v234_v37 = vadd.f32 %v226_v61, %v181_v58 }
 0x14b   :  { %v231_v52 = vadd.f32 %v223_v4, %v178_v9  ;;  %v642_v42 = vadd.f32 %v634_v14, %v2408_v60 }
 0x14c   :  { %v659_v36 = vpop.permute.xlu1 %658  ;;  %v282_v13 = vadd.f32 %v274_v19, %v229_v5  ;;  %v287_v24 = vadd.f32 %v279_v10, %v234_v37  ;;  %v4349_v5 = vld [vmem:[#allocation7_spill] sm:$0xff] }
 0x14d   :  { %v683_v56 = vmul.f32 %v2323_v26, %v659_v36  ;;  %v4337_v36 = vld [vmem:[#allocation9_spill] sm:$0xff]  ;;  %v276_v12 = vmul.f32 %v2323_v26, %v4349_v5 }
 0x14e   :  { %v2503_v43 = vadd.f32 %v2331_v22, %v282_v13  ;;  %v2509_v49 = vadd.f32 %v2331_v22, %v287_v24 }
 0x14f   :  { %v691_v20 = vadd.f32 %v683_v56, %v643_v28  ;;  %v236_v28 = vadd.f32 %v228_v44, %v183_v8  ;;  %v278_v56 = vmul.f32 %v2323_v26, %v4337_v36  ;;  %v284_v10 = vadd.f32 %v276_v12, %v231_v52 }
 0x151   :  { %v699_v30 = vadd.f32 %v2331_v22, %v691_v20  ;;  %v4338_v20 = vld [vmem:[#allocation11_spill] sm:$0xff]  ;;  %v289_v40 = vadd.f32 %v281_v11, %v236_v28  ;;  %v286_v38 = vadd.f32 %v278_v56, %v233_v6  ;;  %v2546_v33 = vadd.f32 %v2331_v22, %v284_v10 }
 0x153   :  { %1318 = vrot.lane.b32.xlu1 %v699_v30, %s1956_s4  ;;  %v280_v30 = vmul.f32 %v2323_v26, %v4338_v20  ;;  %v2512_v3 = vadd.f32 %v2331_v22, %v289_v40  ;;  %v2515_v62 = vadd.f32 %v2331_v22, %v286_v38 }
 0x155   :  { %v288_v39 = vadd.f32 %v280_v30, %v235_v25 }
 0x157   :  { %v2518_v50 = vadd.f32 %v2331_v22, %v288_v39 }
 0x168   :  { %v714_v58 = vpop.permute.xlu0 %713 }
 0x169   :  { %v2523_v7 = vmul.f32 %v714_v58, %v2503_v43  ;;  %v2526_v53 = vmul.f32 %v714_v58, %v2506_v57  ;;  %v2529_v54 = vmul.f32 %v714_v58, %v2500_v29  ;;  %v2532_v61 = vmul.f32 %v714_v58, %v2515_v62 }
 0x16a   :  { %v2535_v44 = vmul.f32 %v714_v58, %v2509_v49  ;;  %v2538_v8 = vmul.f32 %v714_v58, %v2518_v50  ;;  %v2541_v1 = vmul.f32 %v714_v58, %v2512_v3  ;;  %v2549_v6 = vmul.f32 %v714_v58, %v2546_v33 }
 0x16b   :  { %4342 = vst [vmem:[#allocation8_spill] sm:$0xff] %v2523_v7  ;;  %4343 = vst [vmem:[#allocation10_spill] sm:$0xff] %v2526_v53  ;;  %v2554_v17 = vsel %vm801_vm0, %v2523_v7, -inf  ;;  %v2558_v16 = vsel %vm801_vm0, %v2526_v53, -inf  ;;  %v2566_v19 = vsel %vm801_vm0, %v2529_v54, -inf  ;;  %v2570_v37 = vsel %vm801_vm0, %v2532_v61, -inf }
 0x16c   :  { %4344 = vst [vmem:[#allocation12_spill] sm:$0xff] %v2529_v54  ;;  %4345 = vst [vmem:[#allocation5_spill] sm:$0xff] %v2532_v61  ;;  %v2562_v34 = vsel %vm801_vm0, %v2549_v6, -inf  ;;  %v2574_v28 = vsel %vm801_vm0, %v2535_v44, -inf  ;;  %v2578_v36 = vsel %vm801_vm0, %v2538_v8, -inf  ;;  %v2582_v20 = vsel %vm801_vm0, %v2541_v1, -inf }
 0x16d   :  { %4346 = vst [vmem:[#allocation6_spill] sm:$0xff] %v2535_v44  ;;  %4347 = vst [vmem:[#allocation9_spill] sm:$0xff] %v2538_v8  ;;  %v590_v58 = vmul.f32 %v2308_v63, %v2447_v31  ;;  %v592_v44 = vmul.f32 %v2308_v63, %v2479_v35 }
 0x16e   :  { %4348 = vst [vmem:[#allocation11_spill] sm:$0xff] %v2541_v1  ;;  %4350 = vst [vmem:[#allocation2_spill] sm:$0xff] %v2549_v6 }
 0x16f   :  { %v2696_v51 = vadd.f32 %v592_v44, %v552_v21 }
 0x175   :  { %v619_v11 = vpop.permute.xlu0 %618 }
 0x179   :  { %v623_v25 = vpop.permute.xlu0 %622 }
 0x17b   :  { %v716_v56 = vpop.permute.xlu1 %715 }
 0x17c   :  { %v2585_v30 = vmul.f32 %v716_v56, %v2503_v43  ;;  %v2588_v2 = vmul.f32 %v716_v56, %v2506_v57  ;;  %v2591_v13 = vmul.f32 %v716_v56, %v2546_v33  ;;  %v2594_v18 = vmul.f32 %v716_v56, %v2500_v29 }
 0x17d   :  { %v2597_v24 = vmul.f32 %v716_v56, %v2515_v62  ;;  %v2600_v40 = vmul.f32 %v716_v56, %v2509_v49  ;;  %v2603_v38 = vmul.f32 %v716_v56, %v2518_v50  ;;  %v2606_v39 = vmul.f32 %v716_v56, %v2512_v3 }
 0x17e   :  { %4351 = vst [vmem:[#allocation3_spill] sm:$0xff] %v2591_v13  ;;  %4352 = vst [vmem:[#allocation4_spill] sm:$0xff] %v2594_v18  ;;  %v2610_v48 = vsel %vm801_vm0, %v2585_v30, -inf  ;;  %v2614_v45 = vsel %vm801_vm0, %v2588_v2, -inf  ;;  %v2618_v46 = vsel %vm801_vm0, %v2591_v13, -inf  ;;  %v655_v0 = vpop.permute.xlu0 %654  ;;  %v2628_v4 = vsel %vm801_vm0, %v2594_v18, -inf }
 0x17f   :  { %4353 = vst [vmem:[#allocation7_spill] sm:$0xff] %v2597_v24  ;;  %4354 = vst [vmem:[#allocation13_spill] sm:$0xff] %v2600_v40  ;;  %v2634_v5 = vsel %vm801_vm0, %v2597_v24, -inf  ;;  %v2638_v12 = vsel %vm801_vm0, %v2600_v40, -inf  ;;  %v2642_v52 = vsel %vm801_vm0, %v2603_v38, -inf  ;;  %v2652_v59 = vsel %vm801_vm0, %v2606_v39, -inf }
 0x180   :  { %4355 = vst [vmem:[#allocation14_spill] sm:$0xff] %v2603_v38  ;;  %4356 = vst [vmem:[#allocation15_spill] sm:$0xff] %v2606_v39  ;;  %v682_v10 = vmul.f32 %v2323_v26, %v655_v0  ;;  %v550_v56 = vmul.f32 %v2302_v55, %v2393_v23  ;;  %v4369_v24 = vmax.f32 %v2554_v17, %v2610_v48 }
 0x182   :  { %v720_v41 = vpop.permute.xlu0 %719  ;;  %v690_v31 = vadd.f32 %v682_v10, %v642_v42  ;;  %v637_v42 = vmul.f32 %v2317_v27, %v619_v11  ;;  %v638_v10 = vmul.f32 %v2317_v27, %v623_v25  ;;  %v598_v53 = vadd.f32 %v590_v58, %v550_v56 }
 0x183   :  { %v2663_v9 = vmul.f32 %v720_v41, %v2503_v43  ;;  %v2666_v1 = vmul.f32 %v720_v41, %v2506_v57  ;;  %v2669_v8 = vmul.f32 %v720_v41, %v2500_v29  ;;  %v2672_v60 = vmul.f32 %v720_v41, %v2515_v62 }
 0x184   :  { %v2675_v14 = vmul.f32 %v720_v41, %v2509_v49  ;;  %v2678_v0 = vmul.f32 %v720_v41, %v2518_v50  ;;  %v2681_v23 = vmul.f32 %v720_v41, %v2512_v3  ;;  %v2690_v54 = vmul.f32 %v720_v41, %v2546_v33 }
 0x185   :  { %4357 = vst [vmem:[#allocation16_spill] sm:$0xff] %v2666_v1  ;;  %4358 = vst [vmem:[#allocation17_spill] sm:$0xff] %v2669_v8  ;;  %v698_v6 = vadd.f32 %v2331_v22, %v690_v31  ;;  %v645_v63 = vadd.f32 %v637_v42, %v2412_v47  ;;  %v646_v35 = vadd.f32 %v638_v10, %v598_v53  ;;  %v2701_v11 = vsel %vm801_vm0, %v2663_v9, -inf }
 0x186   :  { %4359 = vst [vmem:[#allocation18_spill] sm:$0xff] %v2672_v60  ;;  %4360 = vst [vmem:[#allocation19_spill] sm:$0xff] %v2675_v14  ;;  %v671_v61 = vpop.permute.xlu0 %670  ;;  %v2705_v25 = vsel %vm801_vm0, %v2666_v1, -inf  ;;  %v2713_v21 = vsel %vm801_vm0, %v2669_v8, -inf  ;;  %v2717_v47 = vsel %vm801_vm0, %v2672_v60, -inf  ;;  %v2721_v53 = vsel %vm801_vm0, %v2675_v14, -inf }
 0x187   :  { %4361 = vst [vmem:[#allocation20_spill] sm:$0xff] %v2678_v0  ;;  %4362 = vst [vmem:[#allocation21_spill] sm:$0xff] %v2681_v23  ;;  %v686_v7 = vmul.f32 %v2323_v26, %v671_v61  ;;  %1316 = vrot.lane.b32.xlu0 %v698_v6, %s1956_s4  ;;  %v2709_v61 = vsel %vm801_vm0, %v2690_v54, -inf  ;;  %v2725_v44 = vsel %vm801_vm0, %v2678_v0, -inf  ;;  %v4372_v1 = vmax.f32 %v2566_v19, %v2628_v4 }
 0x188   :  { %4363 = vst [vmem:[#allocation22_spill] sm:$0xff] %v2690_v54  ;;  %v663_v39 = vpop.permute.xlu1 %662  ;;  %v4371_v54 = vmax.f32 %v2562_v34, %v2618_v46 }
 0x189   :  { %v684_v55 = vmul.f32 %v2323_v26, %v663_v39  ;;  %v694_v6 = vadd.f32 %v686_v7, %v646_v35 }
 0x18a   :  { %v675_v41 = vpop.permute.xlu0 %674 }
 0x18b   :  { %v692_v39 = vadd.f32 %v684_v55, %v2430_v32 }
 0x18c   :  { %v718_v58 = vpop.permute.xlu1 %717 }
 0x18d   :  { %v2729_v56 = vmul.f32 %v718_v58, %v2503_v43  ;;  %v2732_v31 = vmul.f32 %v718_v58, %v2506_v57  ;;  %v2735_v42 = vmul.f32 %v718_v58, %v2546_v33  ;;  %v2738_v10 = vmul.f32 %v718_v58, %v2500_v29 }
 0x18e   :  { %v2741_v38 = vmul.f32 %v718_v58, %v2515_v62  ;;  %v2744_v7 = vmul.f32 %v718_v58, %v2509_v49  ;;  %v2747_v32 = vmul.f32 %v718_v58, %v2518_v50  ;;  %v2750_v55 = vmul.f32 %v718_v58, %v2512_v3  ;;  %v679_v35 = vpop.permute.xlu0 %678 }
 0x18f   :  { %4364 = vst [vmem:[#allocation23_spill] sm:$0xff] %v2732_v31  ;;  %4365 = vst [vmem:[#allocation24_spill] sm:$0xff] %v2735_v42  ;;  %v805_v0 = vsel %vm801_vm0, %v2729_v56, -inf  ;;  %v820_v14 = vsel %vm801_vm0, %v2732_v31, -inf  ;;  %v835_v40 = vsel %vm801_vm0, %v2735_v42, -inf  ;;  %v850_v60 = vsel %vm801_vm0, %v2738_v10, -inf }
 0x190   :  { %4366 = vst [vmem:[#allocation25_spill] sm:$0xff] %v2738_v10  ;;  %4367 = vst [vmem:[#allocation26_spill] sm:$0xff] %v2747_v32  ;;  %v806_v8 = vmax.f32 %v4369_v24, %v805_v0  ;;  %v4370_v58 = vmax.f32 %v2558_v16, %v2614_v45  ;;  %v2769_v13 = vmax.f32 %v4371_v54, %v835_v40  ;;  %v667_v31 = vpop.permute.xlu1 %666  ;;  %v865_v10 = vsel %vm801_vm0, %v2741_v38, -inf }
 0x191   :  { %4368 = vst [vmem:[#allocation27_spill] sm:$0xff] %v2750_v55  ;;  %v2774_v42 = vmax.f32 %v4372_v1, %v850_v60  ;;  %v880_v17 = vsel %vm801_vm0, %v2744_v7, -inf  ;;  %v895_v16 = vsel %vm801_vm0, %v2747_v32, -inf  ;;  %v910_v34 = vsel %vm801_vm0, %v2750_v55, -inf  ;;  %v4408_v32 = vld [vmem:[#allocation10_spill] sm:$0xff] }
 0x192   :  { %v821_v18 = vmax.f32 %v4370_v58, %v820_v14  ;;  %v4373_v54 = vmax.f32 %v2570_v37, %v2634_v5  ;;  %v4374_v1 = vmax.f32 %v2574_v28, %v2638_v12  ;;  %v4375_v40 = vmax.f32 %v2578_v36, %v2642_v52  ;;  %v728_v4 = vpop.permute.xlu0 %727 }
 0x193   :  { %v4376_v45 = vmax.f32 %v2582_v20, %v2652_v59  ;;  %v2804_v37 = vsel %vm801_vm0, %v2681_v23, -inf  ;;  %v700_v5 = vadd.f32 %v2331_v22, %v692_v39  ;;  %v685_v28 = vmul.f32 %v2323_v26, %v667_v31 }
 0x194   :  { %v866_v24 = vmax.f32 %v4373_v54, %v865_v10  ;;  %v2790_v19 = vmax.f32 %v4374_v1, %v880_v17  ;;  %v2795_v48 = vmax.f32 %v4375_v40, %v895_v16  ;;  %v2809_v12 = vmul.f32 %v728_v4, %v2503_v43 }
 0x195   :  { %v2800_v46 = vmax.f32 %v4376_v45, %v910_v34  ;;  %v2812_v36 = vmul.f32 %v728_v4, %v2506_v57  ;;  %v2815_v52 = vmul.f32 %v728_v4, %v2546_v33  ;;  %v2818_v20 = vmul.f32 %v728_v4, %v2500_v29  ;;  %1320 = vrot.lane.b32.xlu0 %v700_v5, %s1956_s4  ;;  %v627_v31 = vpop.permute.xlu1 %626 }
 0x196   :  { %v2821_v59 = vmul.f32 %v728_v4, %v2515_v62  ;;  %v687_v60 = vmul.f32 %v2323_v26, %v675_v41  ;;  %v693_v14 = vadd.f32 %v685_v28, %v645_v63  ;;  %v2826_v0 = vmul.f32 %v728_v4, %v2509_v49 }
 0x197   :  { %4377 = vst [vmem:[#allocation28_spill] sm:$0xff] %v2815_v52  ;;  %v702_v39 = vadd.f32 %v2331_v22, %v694_v6  ;;  %v688_v10 = vmul.f32 %v2323_v26, %v679_v35  ;;  %v2831_v58 = vmul.f32 %v728_v4, %v2518_v50  ;;  %v2834_v17 = vmul.f32 %v728_v4, %v2512_v3 }
 0x198   :  { %v2838_v41 = vsel %vm801_vm0, %v2809_v12, -inf  ;;  %v701_v63 = vadd.f32 %v2331_v22, %v693_v14  ;;  %v2843_v16 = vsel %vm801_vm0, %v2812_v36, -inf  ;;  %v2847_v6 = vsel %vm801_vm0, %v2815_v52, -inf }
 0x199   :  { %4378 = vst [vmem:[#allocation29_spill] sm:$0xff] %v2831_v58  ;;  %4379 = vst [vmem:[#allocation30_spill] sm:$0xff] %v2834_v17  ;;  %v2851_v26 = vsel %vm801_vm0, %v2818_v20, -inf  ;;  %v2855_v35 = vsel %vm801_vm0, %v2821_v59, -inf  ;;  %v639_v34 = vmul.f32 %v2317_v27, %v627_v31  ;;  %v808_v54 = vmax.f32 %v806_v8, %v2701_v11  ;;  %1324 = vrot.lane.b32.xlu0 %v702_v39, %s1956_s4  ;;  %v722_v45 = vpop.permute.xlu1 %721 }
 0x19a   :  { %v823_v1 = vmax.f32 %v821_v18, %v2705_v25  ;;  %v2862_v40 = vsel %vm801_vm0, %v2826_v0, -inf  ;;  %1322 = vrot.lane.b32.xlu1 %v701_v63, %s1956_s4  ;;  %v838_v4 = vmax.f32 %v2769_v13, %v2709_v61  ;;  %v853_v5 = vmax.f32 %v2774_v42, %v2713_v21 }
 0x19b   :  { %v868_v28 = vmax.f32 %v866_v24, %v2717_v47  ;;  %v647_v8 = vadd.f32 %v639_v34, %v2416_v15  ;;  %v2873_v18 = vmul.f32 %v722_v45, %v2503_v43  ;;  %v2876_v11 = vmul.f32 %v722_v45, %v2506_v57 }
 0x19c   :  { %v2879_v25 = vmul.f32 %v722_v45, %v2546_v33  ;;  %v2882_v14 = vmul.f32 %v722_v45, %v2500_v29  ;;  %v2885_v13 = vmul.f32 %v722_v45, %v2515_v62  ;;  %v2888_v61 = vmul.f32 %v722_v45, %v2509_v49 }
 0x19d   :  { %v2891_v15 = vmul.f32 %v722_v45, %v2518_v50  ;;  %v695_v21 = vadd.f32 %v687_v60, %v647_v8  ;;  %v2894_v47 = vmul.f32 %v722_v45, %v2512_v3  ;;  %v809_v42 = vsel %vm801_vm0, %v2873_v18, -inf  ;;  %v631_v60 = vpop.permute.xlu1 %630 }
 0x19e   :  { %v824_v24 = vsel %vm801_vm0, %v2876_v11, -inf  ;;  %v2900_v39 = vmax.f32 %v808_v54, %v809_v42  ;;  %v839_v63 = vsel %vm801_vm0, %v2879_v25, -inf  ;;  %v854_v34 = vsel %vm801_vm0, %v2882_v14, -inf }
 0x19f   :  { %4380 = vst [vmem:[#allocation31_spill] sm:$0xff] %v2891_v15  ;;  %4381 = vst [vmem:[#allocation32_spill] sm:$0xff] %v2894_v47  ;;  %v2902_v31 = vmax.f32 %v823_v1, %v824_v24  ;;  %v703_v45 = vadd.f32 %v2331_v22, %v695_v21  ;;  %v840_v8 = vmax.f32 %v838_v4, %v839_v63  ;;  %v869_v23 = vsel %vm801_vm0, %v2885_v13, -inf }
 0x1a0   :  { %v855_v52 = vmax.f32 %v853_v5, %v854_v34  ;;  %v2911_v55 = vmax.f32 %v868_v28, %v869_v23  ;;  %v883_v54 = vmax.f32 %v2790_v19, %v2721_v53  ;;  %v884_v1 = vsel %vm801_vm0, %v2888_v61, -inf }
 0x1a1   :  { %v898_v42 = vmax.f32 %v2795_v48, %v2725_v44  ;;  %v899_v24 = vsel %vm801_vm0, %v2891_v15, -inf  ;;  %v913_v4 = vmax.f32 %v2800_v46, %v2804_v37  ;;  %v914_v5 = vsel %vm801_vm0, %v2894_v47, -inf  ;;  %1326 = vrot.lane.b32.xlu1 %v703_v45, %s1956_s4  ;;  %v724_v28 = vpop.permute.xlu1 %723 }
 0x1a2   :  { %v640_v23 = vmul.f32 %v2317_v27, %v631_v60  ;;  %v2929_v53 = vsel %vm801_vm0, %v2831_v58, -inf  ;;  %v2933_v44 = vsel %vm801_vm0, %v2834_v17, -inf  ;;  %v885_v19 = vmax.f32 %v883_v54, %v884_v1 }
 0x1a3   :  { %v900_v48 = vmax.f32 %v898_v42, %v899_v24  ;;  %v915_v21 = vmax.f32 %v913_v4, %v914_v5  ;;  %v2937_v37 = vmul.f32 %v724_v28, %v2503_v43  ;;  %v2940_v27 = vmul.f32 %v724_v28, %v2506_v57 }
 0x1a4   :  { %v648_v46 = vadd.f32 %v640_v23, %v2696_v51  ;;  %v2943_v63 = vmul.f32 %v724_v28, %v2546_v33  ;;  %v2946_v34 = vmul.f32 %v724_v28, %v2500_v29  ;;  %v2949_v60 = vmul.f32 %v724_v28, %v2515_v62 }
 0x1a5   :  { %v2952_v45 = vmul.f32 %v724_v28, %v2509_v49  ;;  %v2955_v51 = vmul.f32 %v724_v28, %v2518_v50  ;;  %v2958_v1 = vmul.f32 %v724_v28, %v2512_v3  ;;  %v811_v42 = vsel %vm801_vm0, %v2937_v37, -inf  ;;  %v726_v47 = vpop.permute.xlu1 %725 }
 0x1a6   :  { %4382 = vst [vmem:[#allocation33_spill] sm:$0xff] %v2943_v63  ;;  %v696_v54 = vadd.f32 %v688_v10, %v648_v46  ;;  %v812_v24 = vmax.f32 %v2900_v39, %v811_v42  ;;  %v826_v4 = vsel %vm801_vm0, %v2940_v27, -inf  ;;  %v841_v5 = vsel %vm801_vm0, %v2943_v63, -inf }
 0x1a7   :  { %4383 = vst [vmem:[#allocation34_spill] sm:$0xff] %v2955_v51  ;;  %4384 = vst [vmem:[#allocation35_spill] sm:$0xff] %v2958_v1  ;;  %v856_v10 = vsel %vm801_vm0, %v2946_v34, -inf  ;;  %v827_v46 = vmax.f32 %v2902_v31, %v826_v4  ;;  %v842_v28 = vmax.f32 %v840_v8, %v841_v5  ;;  %v871_v58 = vsel %vm801_vm0, %v2949_v60, -inf }
 0x1a8   :  { %v704_v23 = vadd.f32 %v2331_v22, %v696_v54  ;;  %v857_v17 = vmax.f32 %v855_v52, %v856_v10  ;;  %v886_v39 = vsel %vm801_vm0, %v2952_v45, -inf  ;;  %v901_v42 = vsel %vm801_vm0, %v2955_v51, -inf }
 0x1a9   :  { %v916_v63 = vsel %vm801_vm0, %v2958_v1, -inf  ;;  %v872_v15 = vmax.f32 %v2911_v55, %v871_v58  ;;  %v887_v22 = vmax.f32 %v885_v19, %v886_v39  ;;  %v902_v54 = vmax.f32 %v900_v48, %v901_v42 }
 0x1aa   :  { %v917_v31 = vmax.f32 %v915_v21, %v916_v63  ;;  %1328 = vrot.lane.b32.xlu0 %v704_v23, %s1956_s4  ;;  %v2982_v52 = vmul.f32 %v726_v47, %v2503_v43  ;;  %v2985_v8 = vmul.f32 %v726_v47, %v2506_v57  ;;  %v2988_v4 = vmul.f32 %v726_v47, %v2546_v33 }
 0x1ab   :  { %v2991_v5 = vmul.f32 %v726_v47, %v2500_v29  ;;  %v2994_v10 = vmul.f32 %v726_v47, %v2515_v62  ;;  %v2997_v55 = vmul.f32 %v726_v47, %v2509_v49  ;;  %v3000_v58 = vmul.f32 %v726_v47, %v2518_v50 }
 0x1ac   :  { %v3003_v43 = vmul.f32 %v726_v47, %v2512_v3  ;;  %v813_v57 = vsel %vm801_vm0, %v2982_v52, -inf  ;;  %v828_v33 = vsel %vm801_vm0, %v2985_v8, -inf  ;;  %v843_v29 = vsel %vm801_vm0, %v2988_v4, -inf }
 0x1ad   :  { %4385 = vst [vmem:[#allocation36_spill] sm:$0xff] %v3000_v58  ;;  %v858_v62 = vsel %vm801_vm0, %v2991_v5, -inf  ;;  %v814_v49 = vmax.f32 %v812_v24, %v813_v57  ;;  %v829_v19 = vmax.f32 %v827_v46, %v828_v33  ;;  %v844_v48 = vmax.f32 %v842_v28, %v843_v29 }
 0x1ae   :  { %v859_v50 = vmax.f32 %v857_v17, %v858_v62  ;;  %v873_v3 = vsel %vm801_vm0, %v2994_v10, -inf  ;;  %v888_v47 = vsel %vm801_vm0, %v2997_v55, -inf  ;;  %v903_v21 = vsel %vm801_vm0, %v3000_v58, -inf  ;;  %v4389_v62 = vld [vmem:[#allocation24_spill] sm:$0xff] }
 0x1af   :  { %v918_v63 = vsel %vm801_vm0, %v3003_v43, -inf  ;;  %v3022_v23 = vmax.f32 %v814_v49, %v2838_v41  ;;  %v3025_v24 = vmax.f32 %v829_v19, %v2843_v16  ;;  %v3028_v17 = vmax.f32 %v844_v48, %v2847_v6  ;;  %v4390_v19 = vld [vmem:[#allocation22_spill] sm:$0xff] }
 0x1b0   :  { %v3031_v46 = vmax.f32 %v859_v50, %v2851_v26  ;;  %v874_v28 = vmax.f32 %v872_v15, %v873_v3  ;;  %v889_v39 = vmax.f32 %v887_v22, %v888_v47  ;;  %v904_v42 = vmax.f32 %v902_v54, %v903_v21  ;;  %v4392_v3 = vld [vmem:[#allocation25_spill] sm:$0xff]  ;;  %v4397_v50 = vld [vmem:[#allocation19_spill] sm:$0xff] }
 0x1b1   :  { %v919_v57 = vmax.f32 %v917_v31, %v918_v63  ;;  %v923_v33 = vsub.f32 %v2585_v30, %v3022_v23  ;;  %v924_v41 = vsub.f32 %v2729_v56, %v3022_v23  ;;  %v925_v16 = vsub.f32 %v2663_v9, %v3022_v23  ;;  %v4393_v21 = vld [vmem:[#allocation17_spill] sm:$0xff]  ;;  %v4395_v63 = vld [vmem:[#allocation18_spill] sm:$0xff] }
 0x1b2   :  { %v926_v6 = vsub.f32 %v2873_v18, %v3022_v23  ;;  %v3042_v29 = vmax.f32 %v874_v28, %v2855_v35  ;;  %v3045_v26 = vmax.f32 %v889_v39, %v2862_v40  ;;  %v3048_v15 = vmax.f32 %v904_v42, %v2929_v53  ;;  %v4386_v40 = vld [vmem:[#allocation23_spill] sm:$0xff]  ;;  %v4387_v53 = vld [vmem:[#allocation16_spill] sm:$0xff] }
 0x1b3   :  { %v3051_v30 = vmax.f32 %v919_v57, %v2933_v44  ;;  %v927_v56 = vsub.f32 %v2937_v37, %v3022_v23  ;;  %v928_v9 = vsub.f32 %v2982_v52, %v3022_v23  ;;  %v929_v18 = vsub.f32 %v2809_v12, %v3022_v23  ;;  %v4405_v12 = vld [vmem:[#allocation32_spill] sm:$0xff] }
 0x1b4   :  { %v931_v35 = vsub.f32 %v2588_v2, %v3025_v24  ;;  %v932_v22 = vsub.f32 %v4386_v40, %v3025_v24  ;;  %v933_v54 = vsub.f32 %v4387_v53, %v3025_v24  ;;  %v934_v44 = vsub.f32 %v2876_v11, %v3025_v24  ;;  %v4388_v2 = vld [vmem:[#allocation3_spill] sm:$0xff]  ;;  %v4396_v53 = vld [vmem:[#allocation13_spill] sm:$0xff]  ;;  %v4407_v11 = vld [vmem:[#allocation8_spill] sm:$0xff] }
 0x1b5   :  { %v935_v37 = vsub.f32 %v2940_v27, %v3025_v24  ;;  %v4391_v27 = vld [vmem:[#allocation4_spill] sm:$0xff]  ;;  %v4394_v40 = vld [vmem:[#allocation7_spill] sm:$0xff]  ;;  %v988_v58 = vmul.f32 1.442695, %v923_v33  ;;  %v990_v48 = vmul.f32 1.442695, %v924_v41  ;;  %v4409_v33 = vsub.f32 %v2985_v8, %v3025_v24 }
 0x1b6   :  { %v992_v52 = vmul.f32 1.442695, %v925_v16  ;;  %v994_v51 = vmul.f32 1.442695, %v926_v6  ;;  %v996_v28 = vmul.f32 1.442695, %v927_v56  ;;  %v4410_v41 = vsub.f32 %v2812_v36, %v3025_v24 }
 0x1b7   :  { %1807 = vpow2.f32 %v988_v58  ;;  %v998_v39 = vmul.f32 1.442695, %v928_v9  ;;  %v1000_v1 = vmul.f32 1.442695, %v929_v18  ;;  %v1004_v42 = vmul.f32 1.442695, %v931_v35 }
 0x1b8   :  { %1809 = vpow2.f32 %v990_v48  ;;  %v1006_v57 = vmul.f32 1.442695, %v932_v22  ;;  %v1008_v31 = vmul.f32 1.442695, %v933_v54  ;;  %v1010_v49 = vmul.f32 1.442695, %v934_v44 }
 0x1b9   :  { %1811 = vpow2.f32 %v992_v52  ;;  %v1012_v47 = vmul.f32 1.442695, %v935_v37  ;;  %v1014_v58 = vmul.f32 1.442695, %v4409_v33  ;;  %v1016_v16 = vmul.f32 1.442695, %v4410_v41 }
 0x1ba   :  { %1813 = vpow2.f32 %v994_v51  ;;  %v4411_v51 = vld [vmem:[#allocation33_spill] sm:$0xff]  ;;  %v944_v9 = vsub.f32 %v2988_v4, %v3028_v17  ;;  %v4413_v18 = vld [vmem:[#allocation28_spill] sm:$0xff]  ;;  %v4414_v35 = vsub.f32 %v4389_v62, %v3028_v17  ;;  %v4415_v22 = vsub.f32 %v4390_v19, %v3028_v17 }
 0x1bb   :  { %1815 = vpow2.f32 %v996_v28  ;;  %v943_v6 = vsub.f32 %v4411_v51, %v3028_v17  ;;  %v945_v8 = vsub.f32 %v4413_v18, %v3028_v17  ;;  %v4416_v44 = vsub.f32 %v2879_v25, %v3028_v17  ;;  %v4419_v52 = vld [vmem:[#allocation12_spill] sm:$0xff]  ;;  %v4420_v62 = vld [vmem:[#allocation5_spill] sm:$0xff] }
 0x1bc   :  { %1817 = vpow2.f32 %v998_v39  ;;  %v1022_v36 = vmul.f32 1.442695, %v4414_v35  ;;  %v1024_v54 = vmul.f32 1.442695, %v4415_v22  ;;  %v4423_v39 = vld [vmem:[#allocation9_spill] sm:$0xff]  ;;  %v4430_v35 = vsub.f32 %v4392_v3, %v3031_v46 }
 0x1bd   :  { %1819 = vpow2.f32 %v1000_v1  ;;  %v4412_v1 = vsub.f32 %v4388_v2, %v3028_v17  ;;  %v1026_v37 = vmul.f32 1.442695, %v4416_v44  ;;  %v1028_v25 = vmul.f32 1.442695, %v943_v6 }
 0x1be   :  { %1821 = vpow2.f32 %v1004_v42  ;;  %v1030_v41 = vmul.f32 1.442695, %v944_v9  ;;  %v1032_v51 = vmul.f32 1.442695, %v945_v8  ;;  %v4428_v6 = vsub.f32 %v4391_v27, %v3031_v46 }
 0x1bf   :  { %1823 = vpow2.f32 %v1006_v57  ;;  %v1020_v56 = vmul.f32 1.442695, %v4412_v1  ;;  %v4424_v57 = vld [vmem:[#allocation11_spill] sm:$0xff]  ;;  %v1038_v22 = vmul.f32 1.442695, %v4430_v35  ;;  %v4432_v9 = vsub.f32 %v4393_v21, %v3031_v46 }
 0x1c0   :  { %1825 = vpow2.f32 %v1008_v31  ;;  %v4417_v31 = vld [vmem:[#allocation2_spill] sm:$0xff]  ;;  %v4434_v27 = vsub.f32 %v2882_v14, %v3031_v46  ;;  %v4436_v3 = vsub.f32 %v2946_v34, %v3031_v46  ;;  %v4438_v21 = vsub.f32 %v2991_v5, %v3031_v46 }
 0x1c1   :  { %1827 = vpow2.f32 %v1010_v49  ;;  %v1040_v8 = vmul.f32 1.442695, %v4432_v9  ;;  %v4440_v14 = vsub.f32 %v2818_v20, %v3031_v46  ;;  %v4442_v34 = vsub.f32 %v4394_v40, %v3042_v29 }
 0x1c2   :  { %1829 = vpow2.f32 %v1012_v47  ;;  %v4421_v47 = vld [vmem:[#allocation6_spill] sm:$0xff]  ;;  %v1042_v44 = vmul.f32 1.442695, %v4434_v27  ;;  %v4444_v5 = vsub.f32 %v2741_v38, %v3042_v29  ;;  %v4446_v20 = vsub.f32 %v4395_v63, %v3042_v29 }
 0x1c3   :  { %1831 = vpow2.f32 %v1014_v58  ;;  %v4448_v40 = vsub.f32 %v2885_v13, %v3042_v29  ;;  %v4450_v38 = vsub.f32 %v2949_v60, %v3042_v29  ;;  %v4452_v63 = vsub.f32 %v2994_v10, %v3042_v29 }
 0x1c4   :  { %v3181_v2 = vpop.eup %1807  ;;  %1833 = vpow2.f32 %v1016_v16  ;;  %v4454_v13 = vsub.f32 %v2821_v59, %v3042_v29  ;;  %v4456_v60 = vsub.f32 %v4396_v53, %v3045_v26  ;;  %v4458_v10 = vsub.f32 %v2744_v7, %v3045_v26 }
 0x1c5   :  { %4418 = vst [vmem:[#allocation23_spill] sm:$0xff] %v3181_v2  ;;  %v3189_v28 = vpop.eup %1809  ;;  %1835 = vpow2.f32 %v1020_v56  ;;  %v1036_v56 = vmul.f32 1.442695, %v4428_v6  ;;  %v4460_v59 = vsub.f32 %v4397_v50, %v3045_v26  ;;  %v4462_v53 = vsub.f32 %v2888_v61, %v3045_v26 }
 0x1c6   :  { %4422 = vst [vmem:[#allocation16_spill] sm:$0xff] %v3189_v28  ;;  %v3195_v58 = vpop.eup %1811  ;;  %1837 = vpow2.f32 %v1022_v36  ;;  %v4464_v7 = vsub.f32 %v2952_v45, %v3045_v26  ;;  %v4466_v50 = vsub.f32 %v2997_v55, %v3045_v26  ;;  %v4468_v61 = vsub.f32 %v2826_v0, %v3045_v26 }
 0x1c7   :  { %4425 = vst [vmem:[#allocation3_spill] sm:$0xff] %v3195_v58  ;;  %v3197_v16 = vpop.eup %1813  ;;  %1839 = vpow2.f32 %v1024_v54 }
 0x1c8   :  { %4426 = vst [vmem:[#allocation24_spill] sm:$0xff] %v3197_v16  ;;  %v3199_v1 = vpop.eup %1815  ;;  %1841 = vpow2.f32 %v1026_v37 }
 0x1c9   :  { %4427 = vst [vmem:[#allocation22_spill] sm:$0xff] %v3199_v1  ;;  %v3204_v18 = vpop.eup %1817  ;;  %1843 = vpow2.f32 %v1028_v25  ;;  %v1044_v25 = vmul.f32 1.442695, %v4436_v3 }
 0x1ca   :  { %4429 = vst [vmem:[#allocation4_spill] sm:$0xff] %v3204_v18  ;;  %v3209_v36 = vpop.eup %1819  ;;  %1845 = vpow2.f32 %v1030_v41  ;;  %v1046_v41 = vmul.f32 1.442695, %v4438_v21 }
 0x1cb   :  { %4431 = vst [vmem:[#allocation25_spill] sm:$0xff] %v3209_v36  ;;  %v3214_v54 = vpop.eup %1821  ;;  %1847 = vpow2.f32 %v1032_v51  ;;  %v1048_v51 = vmul.f32 1.442695, %v4440_v14 }
 0x1cc   :  { %4433 = vst [vmem:[#allocation17_spill] sm:$0xff] %v3214_v54  ;;  %v3219_v37 = vpop.eup %1823  ;;  %1849 = vpow2.f32 %v1036_v56  ;;  %v1052_v56 = vmul.f32 1.442695, %v4442_v34 }
 0x1cd   :  { %4435 = vst [vmem:[#allocation7_spill] sm:$0xff] %v3219_v37  ;;  %v3224_v6 = vpop.eup %1825  ;;  %1851 = vpow2.f32 %v1038_v22  ;;  %v1054_v22 = vmul.f32 1.442695, %v4444_v5 }
 0x1ce   :  { %4437 = vst [vmem:[#allocation18_spill] sm:$0xff] %v3224_v6  ;;  %v3229_v35 = vpop.eup %1827  ;;  %1853 = vpow2.f32 %v1040_v8  ;;  %v1056_v8 = vmul.f32 1.442695, %v4446_v20 }
 0x1cf   :  { %4439 = vst [vmem:[#allocation13_spill] sm:$0xff] %v3229_v35  ;;  %v3234_v9 = vpop.eup %1829  ;;  %1855 = vpow2.f32 %v1042_v44  ;;  %v1058_v44 = vmul.f32 1.442695, %v4448_v40 }
 0x1d0   :  { %4441 = vst [vmem:[#allocation19_spill] sm:$0xff] %v3234_v9  ;;  %v3239_v27 = vpop.eup %1831  ;;  %1857 = vpow2.f32 %v1044_v25  ;;  %v1060_v25 = vmul.f32 1.442695, %v4450_v38 }
 0x1d1   :  { %4443 = vst [vmem:[#allocation32_spill] sm:$0xff] %v3239_v27  ;;  %v3244_v3 = vpop.eup %1833  ;;  %1859 = vpow2.f32 %v1046_v41  ;;  %v1062_v41 = vmul.f32 1.442695, %v4452_v63 }
 0x1d2   :  { %4445 = vst [vmem:[#allocation8_spill] sm:$0xff] %v3244_v3  ;;  %v3249_v21 = vpop.eup %1835  ;;  %1861 = vpow2.f32 %v1048_v51  ;;  %v1064_v51 = vmul.f32 1.442695, %v4454_v13 }
 0x1d3   :  { %4447 = vst [vmem:[#allocation10_spill] sm:$0xff] %v3249_v21  ;;  %v3254_v14 = vpop.eup %1837  ;;  %1863 = vpow2.f32 %v1052_v56  ;;  %v1068_v56 = vmul.f32 1.442695, %v4456_v60 }
 0x1d4   :  { %4449 = vst [vmem:[#allocation33_spill] sm:$0xff] %v3254_v14  ;;  %v3259_v34 = vpop.eup %1839  ;;  %1865 = vpow2.f32 %v1054_v22  ;;  %v1070_v22 = vmul.f32 1.442695, %v4458_v10 }
 0x1d5   :  { %4451 = vst [vmem:[#allocation28_spill] sm:$0xff] %v3259_v34  ;;  %v3264_v5 = vpop.eup %1841  ;;  %1867 = vpow2.f32 %v1056_v8  ;;  %v1072_v8 = vmul.f32 1.442695, %v4460_v59 }
 0x1d6   :  { %4453 = vst [vmem:[#allocation2_spill] sm:$0xff] %v3264_v5  ;;  %v3269_v20 = vpop.eup %1843  ;;  %1869 = vpow2.f32 %v1058_v44  ;;  %v1074_v44 = vmul.f32 1.442695, %v4462_v53 }
 0x1d7   :  { %4455 = vst [vmem:[#allocation12_spill] sm:$0xff] %v3269_v20  ;;  %v3274_v40 = vpop.eup %1845  ;;  %1871 = vpow2.f32 %v1060_v25  ;;  %v1076_v25 = vmul.f32 1.442695, %v4464_v7 }
 0x1d8   :  { %4457 = vst [vmem:[#allocation5_spill] sm:$0xff] %v3274_v40  ;;  %v3279_v38 = vpop.eup %1847  ;;  %1873 = vpow2.f32 %v1062_v41  ;;  %v1078_v41 = vmul.f32 1.442695, %v4466_v50 }
 0x1d9   :  { %4459 = vst [vmem:[#allocation6_spill] sm:$0xff] %v3279_v38  ;;  %v3284_v63 = vpop.eup %1849  ;;  %1875 = vpow2.f32 %v1064_v51  ;;  %v1080_v51 = vmul.f32 1.442695, %v4468_v61 }
 0x1da   :  { %4461 = vst [vmem:[#allocation9_spill] sm:$0xff] %v3284_v63  ;;  %v3289_v13 = vpop.eup %1851  ;;  %1877 = vpow2.f32 %v1068_v56  ;;  %v4470_v56 = vld [vmem:[#allocation14_spill] sm:$0xff] }
 0x1db   :  { %4463 = vst [vmem:[#allocation11_spill] sm:$0xff] %v3289_v13  ;;  %v3294_v60 = vpop.eup %1853  ;;  %1879 = vpow2.f32 %v1070_v22  ;;  %v4471_v45 = vsub.f32 %v4470_v56, %v3048_v15  ;;  %v4473_v22 = vld [vmem:[#allocation26_spill] sm:$0xff] }
 0x1dc   :  { %4465 = vst [vmem:[#allocation37_spill] sm:$0xff] %v3294_v60  ;;  %v3299_v10 = vpop.eup %1855  ;;  %1881 = vpow2.f32 %v1072_v8  ;;  %v4474_v55 = vsub.f32 %v4473_v22, %v3048_v15  ;;  %v4476_v8 = vld [vmem:[#allocation20_spill] sm:$0xff] }
 0x1dd   :  { %4467 = vst [vmem:[#allocation38_spill] sm:$0xff] %v3299_v10  ;;  %v3304_v59 = vpop.eup %1857  ;;  %1883 = vpow2.f32 %v1074_v44  ;;  %v1084_v53 = vmul.f32 1.442695, %v4471_v45  ;;  %v4477_v0 = vsub.f32 %v4476_v8, %v3048_v15  ;;  %v4479_v44 = vld [vmem:[#allocation31_spill] sm:$0xff] }
 0x1de   :  { %4469 = vst [vmem:[#allocation39_spill] sm:$0xff] %v3304_v59  ;;  %v3309_v7 = vpop.eup %1859  ;;  %1885 = vpow2.f32 %v1076_v25  ;;  %v1086_v50 = vmul.f32 1.442695, %v4474_v55  ;;  %v4480_v56 = vsub.f32 %v4479_v44, %v3048_v15  ;;  %v4482_v25 = vld [vmem:[#allocation34_spill] sm:$0xff] }
 0x1df   :  { %4472 = vst [vmem:[#allocation14_spill] sm:$0xff] %v3309_v7  ;;  %v3314_v33 = vpop.eup %1861  ;;  %1887 = vpow2.f32 %v1078_v41  ;;  %v1088_v61 = vmul.f32 1.442695, %v4477_v0  ;;  %v4483_v22 = vsub.f32 %v4482_v25, %v3048_v15  ;;  %v4485_v41 = vld [vmem:[#allocation36_spill] sm:$0xff] }
 0x1e0   :  { %4475 = vst [vmem:[#allocation26_spill] sm:$0xff] %v3314_v33  ;;  %v3319_v42 = vpop.eup %1863  ;;  %1889 = vpow2.f32 %v1080_v51  ;;  %v1090_v45 = vmul.f32 1.442695, %v4480_v56  ;;  %v4486_v8 = vsub.f32 %v4485_v41, %v3048_v15  ;;  %v4488_v51 = vld [vmem:[#allocation15_spill] sm:$0xff] }
 0x1e1   :  { %4478 = vst [vmem:[#allocation20_spill] sm:$0xff] %v3319_v42  ;;  %v3324_v19 = vpop.eup %1865  ;;  %1891 = vpow2.f32 %v1084_v53  ;;  %v1092_v55 = vmul.f32 1.442695, %v4483_v22  ;;  %v4489_v44 = vsub.f32 %v4488_v51, %v3051_v30  ;;  %v4491_v53 = vld [vmem:[#allocation27_spill] sm:$0xff] }
 0x1e2   :  { %4481 = vst [vmem:[#allocation31_spill] sm:$0xff] %v3324_v19  ;;  %v3329_v48 = vpop.eup %1867  ;;  %1893 = vpow2.f32 %v1086_v50  ;;  %v1094_v0 = vmul.f32 1.442695, %v4486_v8  ;;  %v4492_v25 = vsub.f32 %v4491_v53, %v3051_v30  ;;  %v4494_v50 = vld [vmem:[#allocation21_spill] sm:$0xff] }
 0x1e3   :  { %4484 = vst [vmem:[#allocation34_spill] sm:$0xff] %v3329_v48  ;;  %v3334_v49 = vpop.eup %1869  ;;  %1895 = vpow2.f32 %v1088_v61  ;;  %v1100_v56 = vmul.f32 1.442695, %v4489_v44  ;;  %v4495_v41 = vsub.f32 %v4494_v50, %v3051_v30  ;;  %v4497_v61 = vsub.f32 %v4405_v12, %v3051_v30 }
 0x1e4   :  { %4487 = vst [vmem:[#allocation36_spill] sm:$0xff] %v3334_v49  ;;  %v3339_v4 = vpop.eup %1871  ;;  %1897 = vpow2.f32 %v1090_v45  ;;  %v1102_v22 = vmul.f32 1.442695, %v4492_v25  ;;  %v4499_v45 = vld [vmem:[#allocation29_spill] sm:$0xff] }
 0x1e5   :  { %4490 = vst [vmem:[#allocation15_spill] sm:$0xff] %v3339_v4  ;;  %v3344_v48 = vpop.eup %1873  ;;  %1899 = vpow2.f32 %v1092_v55  ;;  %v1104_v8 = vmul.f32 1.442695, %v4495_v41  ;;  %v1106_v51 = vmul.f32 1.442695, %v4497_v61  ;;  %v4500_v53 = vsub.f32 %v4499_v45, %v3048_v15 }
 0x1e6   :  { %4493 = vst [vmem:[#allocation27_spill] sm:$0xff] %v3344_v48  ;;  %v3349_v49 = vpop.eup %1875  ;;  %1901 = vpow2.f32 %v1094_v0  ;;  %v4501_v55 = vsub.f32 %v4407_v11, %v3022_v23  ;;  %v4503_v0 = vld [vmem:[#allocation35_spill] sm:$0xff]  ;;  %v4505_v61 = vsub.f32 %v3003_v43, %v3051_v30  ;;  %v4508_v23 = vld [vmem:[#allocation30_spill] sm:$0xff]  ;;  %v4510_v43 = vsub.f32 %v4417_v31, %v3028_v17 }
 0x1e7   :  { %4496 = vst [vmem:[#allocation21_spill] sm:$0xff] %v3349_v49  ;;  %v3354_v44 = vpop.eup %1877  ;;  %v3359_v25 = vmul.f32 1.442695, %v4500_v53  ;;  %1903 = vpow2.f32 %v1100_v56  ;;  %v4504_v49 = vsub.f32 %v4503_v0, %v3051_v30  ;;  %v4506_v56 = vsub.f32 %v4408_v32, %v3025_v24 }
 0x1e8   :  { %4498 = vst [vmem:[#allocation40_spill] sm:$0xff] %v3354_v44  ;;  %v986_v50 = vmul.f32 1.442695, %v4501_v55  ;;  %v3364_v41 = vpop.eup %1879  ;;  %1905 = vpow2.f32 %v1102_v22  ;;  %v3374_v44 = vmul.f32 1.442695, %v4505_v61  ;;  %v4509_v11 = vsub.f32 %v4508_v23, %v3051_v30 }
 0x1e9   :  { %4502 = vst [vmem:[#allocation29_spill] sm:$0xff] %v3364_v41  ;;  %v3369_v12 = vmul.f32 1.442695, %v4504_v49  ;;  %v1002_v45 = vmul.f32 1.442695, %v4506_v56  ;;  %v3379_v53 = vpop.eup %1881  ;;  %1907 = vpow2.f32 %v1104_v8  ;;  %v3388_v49 = vsel %vm801_vm0, %v3204_v18, 0.0 }
 0x1ea   :  { %4507 = vst [vmem:[#allocation35_spill] sm:$0xff] %v3379_v53  ;;  %v3384_v22 = vmul.f32 1.442695, %v4509_v11  ;;  %v1018_v55 = vmul.f32 1.442695, %v4510_v43  ;;  %v3393_v0 = vpop.eup %1883  ;;  %1909 = vpow2.f32 %v1106_v51  ;;  %v4512_v32 = vsub.f32 %v4419_v52, %v3031_v46 }
 0x1eb   :  { %4511 = vst [vmem:[#allocation30_spill] sm:$0xff] %v3393_v0  ;;  %v4513_v8 = vsub.f32 %v4420_v62, %v3042_v29  ;;  %v4514_v56 = vsub.f32 %v4421_v47, %v3045_v26  ;;  %v3404_v11 = vpop.eup %1885  ;;  %1911 = vpow2.f32 %v986_v50  ;;  %v4516_v17 = vsub.f32 %v4423_v39, %v3048_v15 }
 0x1ec   :  { %v1034_v24 = vmul.f32 1.442695, %v4512_v32  ;;  %4515 = vst [vmem:[#allocation41_spill] sm:$0xff] %v3404_v11  ;;  %v4517_v51 = vsub.f32 %v4424_v57, %v3051_v30  ;;  %v3414_v52 = vsel %vm801_vm0, %v3181_v2, 0.0  ;;  %v3416_v29 = vpop.eup %1887  ;;  %1913 = vpow2.f32 %v1002_v45 }
 0x1ed   :  { %v1050_v61 = vmul.f32 1.442695, %v4513_v8  ;;  %v1066_v23 = vmul.f32 1.442695, %v4514_v56  ;;  %v1082_v31 = vmul.f32 1.442695, %v4516_v17  ;;  %v3430_v30 = vpop.eup %1889  ;;  %1915 = vpow2.f32 %v1018_v55 }
 0x1ee   :  { %v1098_v46 = vmul.f32 1.442695, %v4517_v51  ;;  %4518 = vst [vmem:[#allocation42_spill] sm:$0xff] %v3416_v29  ;;  %v3420_v26 = vsel %vm801_vm0, %v3189_v28, 0.0  ;;  %v3424_v62 = vsel %vm801_vm0, %v3195_v58, 0.0  ;;  %v3428_v15 = vsel %vm801_vm0, %v3197_v16, 0.0  ;;  %v3444_v50 = vpop.eup %1891 }
 0x1ef   :  { %4519 = vst [vmem:[#allocation43_spill] sm:$0xff] %v3430_v30  ;;  %v3434_v47 = vsel %vm801_vm0, %v3199_v1, 0.0  ;;  %v3438_v39 = vsel %vm801_vm0, %v3209_v36, 0.0  ;;  %v3442_v57 = vsel %vm801_vm0, %v3214_v54, 0.0  ;;  %4520 = vst [vmem:[#allocation44_spill] sm:$0xff] %v3444_v50  ;;  %1917 = vpow2.f32 %v1034_v24  ;;  %v3458_v32 = vpop.eup %1893 }
 0x1f0   :  { %v3448_v45 = vsel %vm801_vm0, %v3219_v37, 0.0  ;;  %v3452_v43 = vsel %vm801_vm0, %v3224_v6, 0.0  ;;  %v3456_v55 = vsel %vm801_vm0, %v3229_v35, 0.0  ;;  %4521 = vst [vmem:[#allocation45_spill] sm:$0xff] %v3458_v32  ;;  %v3462_v8 = vsel %vm801_vm0, %v3239_v27, 0.0  ;;  %v3472_v17 = vpop.eup %1895 }
 0x1f1   :  { %1919 = vpow2.f32 %v1050_v61  ;;  %v3466_v24 = vsel %vm801_vm0, %v3234_v9, 0.0  ;;  %v3470_v56 = vsel %vm801_vm0, %v3244_v3, 0.0  ;;  %4522 = vst [vmem:[#allocation46_spill] sm:$0xff] %v3472_v17  ;;  %v1145_v51 = vsel %vm801_vm0, %v3249_v21, 0.0  ;;  %v3484_v18 = vpop.eup %1897 }
 0x1f2   :  { %1921 = vpow2.f32 %v1066_v23  ;;  %v3478_v36 = vsel %vm801_vm0, %v3254_v14, 0.0  ;;  %v3482_v61 = vsel %vm801_vm0, %v3259_v34, 0.0  ;;  %4523 = vst [vmem:[#allocation47_spill] sm:$0xff] %v3484_v18  ;;  %v3488_v1 = vsel %vm801_vm0, %v3274_v40, 0.0  ;;  %v3498_v3 = vpop.eup %1899 }
 0x1f3   :  { %1923 = vpow2.f32 %v1082_v31  ;;  %v3492_v23 = vsel %vm801_vm0, %v3264_v5, 0.0  ;;  %v3496_v16 = vsel %vm801_vm0, %v3269_v20, 0.0  ;;  %4524 = vst [vmem:[#allocation48_spill] sm:$0xff] %v3498_v3  ;;  %v3502_v34 = vsel %vm801_vm0, %v3279_v38, 0.0  ;;  %v3510_v5 = vpop.eup %1901 }
 0x1f4   :  { %1925 = vpow2.f32 %v1098_v46  ;;  %v1160_v40 = vsel %vm801_vm0, %v3284_v63, 0.0  ;;  %v3508_v31 = vsel %vm801_vm0, %v3289_v13, 0.0  ;;  %4525 = vst [vmem:[#allocation49_spill] sm:$0xff] %v3510_v5  ;;  %v3514_v20 = vsel %vm801_vm0, %v3309_v7, 0.0  ;;  %v3528_v9 = vpop.eup %1903  ;;  %v4527_v63 = vld [vmem:[#allocation34_spill] sm:$0xff] }
 0x1f5   :  { %v3518_v46 = vsel %vm801_vm0, %v3294_v60, 0.0  ;;  %v3522_v38 = vsel %vm801_vm0, %v3299_v10, 0.0  ;;  %v3526_v27 = vsel %vm801_vm0, %v3304_v59, 0.0  ;;  %4526 = vst [vmem:[#allocation50_spill] sm:$0xff] %v3528_v9  ;;  %v3532_v35 = vsel %vm801_vm0, %v3314_v33, 0.0  ;;  %v3542_v21 = vpop.eup %1905  ;;  %v4529_v33 = vld [vmem:[#allocation36_spill] sm:$0xff] }
 0x1f6   :  { %v1175_v7 = vsel %vm801_vm0, %v3319_v42, 0.0  ;;  %v1177_v60 = vsel %vm801_vm0, %v3324_v19, 0.0  ;;  %v3540_v10 = vsel %vm801_vm0, %v4527_v63, 0.0  ;;  %4528 = vst [vmem:[#allocation51_spill] sm:$0xff] %v3542_v21  ;;  %1927 = vpow2.f32 %v3359_v25  ;;  %v3557_v19 = vpop.eup %1907  ;;  %v4531_v63 = vld [vmem:[#allocation21_spill] sm:$0xff]  ;;  %v4532_v25 = vld [vmem:[#allocation40_spill] sm:$0xff] }
 0x1f7   :  { %v3547_v59 = vsel %vm801_vm0, %v3344_v48, 0.0  ;;  %v3551_v13 = vsel %vm801_vm0, %v4529_v33, 0.0  ;;  %v3555_v42 = vsel %vm801_vm0, %v3339_v4, 0.0  ;;  %4530 = vst [vmem:[#allocation52_spill] sm:$0xff] %v3557_v19  ;;  %1929 = vpow2.f32 %v3369_v12  ;;  %v3568_v33 = vpop.eup %1909 }
 0x1f8   :  { %v3562_v14 = vsel %vm801_vm0, %v4531_v63, 0.0  ;;  %v1190_v48 = vsel %vm801_vm0, %v4532_v25, 0.0  ;;  %v1192_v6 = vsel %vm801_vm0, %v3364_v41, 0.0  ;;  %4533 = vst [vmem:[#allocation53_spill] sm:$0xff] %v3568_v33  ;;  %1931 = vpow2.f32 %v3374_v44  ;;  %v3581_v54 = vpop.eup %1911 }
 0x1f9   :  { %v1194_v4 = vsel %vm801_vm0, %v3379_v53, 0.0  ;;  %v3575_v12 = vsel %vm801_vm0, %v3393_v0, 0.0  ;;  %v3579_v63 = vsel %vm801_vm0, %v3404_v11, 0.0  ;;  %4534 = vst [vmem:[#allocation54_spill] sm:$0xff] %v3581_v54  ;;  %1933 = vpow2.f32 %v3384_v22  ;;  %v3594_v53 = vpop.eup %1913 }
 0x1fa   :  { %v3586_v25 = vsel %vm801_vm0, %v3416_v29, 0.0  ;;  %v3590_v44 = vsel %vm801_vm0, %v3430_v30, 0.0  ;;  %v1205_v0 = vsel %vm801_vm0, %v3444_v50, 0.0  ;;  %4536 = vst [vmem:[#allocation56_spill] sm:$0xff] %v3594_v53  ;;  %v1114_v11 = vsel %vm801_vm0, %v3581_v54, 0.0  ;;  %v3604_v37 = vpop.eup %1915 }
 0x1fb   :  { %4535 = vst [vmem:[#allocation55_spill] sm:$0xff] %v3590_v44  ;;  %v1207_v41 = vsel %vm801_vm0, %v3458_v32, 0.0  ;;  %v1209_v22 = vsel %vm801_vm0, %v3472_v17, 0.0  ;;  %v1211_v29 = vsel %vm801_vm0, %v3484_v18, 0.0  ;;  %4537 = vst [vmem:[#allocation57_spill] sm:$0xff] %v3604_v37  ;;  %v3608_v30 = vsel %vm801_vm0, %v3510_v5, 0.0 }
 0x1fc   :  { %v1116_v50 = vadd.f32 %v3414_v52, %v1114_v11  ;;  %v1129_v58 = vsel %vm801_vm0, %v3594_v53, 0.0  ;;  %v3615_v32 = vsel %vm801_vm0, %v3498_v3, 0.0  ;;  %v3617_v2 = vpop.eup %1917  ;;  %v1144_v18 = vsel %vm801_vm0, %v3604_v37, 0.0 }
 0x1fd   :  { %v1131_v17 = vadd.f32 %v3442_v57, %v1129_v58  ;;  %v1220_v5 = vsel %vm801_vm0, %v3528_v9, 0.0  ;;  %v1222_v11 = vsel %vm801_vm0, %v3542_v21, 0.0  ;;  %v1146_v28 = vadd.f32 %v1145_v51, %v1144_v18 }
 0x1fe   :  { %v3626_v52 = vpop.eup %1919  ;;  %v1118_v53 = vadd.f32 %v3420_v26, %v1116_v50  ;;  %v1159_v3 = vsel %vm801_vm0, %v3617_v2, 0.0  ;;  %v1224_v58 = vsel %vm801_vm0, %v3557_v19, 0.0  ;;  %v1226_v21 = vsel %vm801_vm0, %v3568_v33, 0.0 }
 0x1ff   :  { %v3633_v57 = vpop.eup %1921  ;;  %v1133_v37 = vadd.f32 %v3448_v45, %v1131_v17  ;;  %v1161_v54 = vadd.f32 %v1160_v40, %v1159_v3  ;;  %v1174_v9 = vsel %vm801_vm0, %v3626_v52, 0.0  ;;  %v1148_v26 = vadd.f32 %v3478_v36, %v1146_v28 }
 0x200   :  { %v3640_v44 = vpop.eup %1923  ;;  %v1120_v18 = vadd.f32 %v3424_v62, %v1118_v53  ;;  %v1176_v50 = vadd.f32 %v1175_v7, %v1174_v9  ;;  %v1189_v51 = vsel %vm801_vm0, %v3633_v57, 0.0 }
 0x201   :  { %v3646_v19 = vpop.eup %1925  ;;  %v1135_v3 = vadd.f32 %v3452_v43, %v1133_v37  ;;  %v1163_v40 = vadd.f32 %v3508_v31, %v1161_v54  ;;  %v1191_v45 = vadd.f32 %v1190_v48, %v1189_v51  ;;  %v1204_v17 = vsel %vm801_vm0, %v3640_v44, 0.0 }
 0x202   :  { %v1122_v33 = vadd.f32 %v3428_v15, %v1120_v18  ;;  %v1150_v53 = vadd.f32 %v3482_v61, %v1148_v26  ;;  %v1178_v62 = vadd.f32 %v1177_v60, %v1176_v50  ;;  %v1206_v28 = vadd.f32 %v1205_v0, %v1204_v17 }
 0x203   :  { %v1137_v36 = vadd.f32 %v3456_v55, %v1135_v3  ;;  %v1165_v9 = vadd.f32 %v3518_v46, %v1163_v40  ;;  %v1193_v7 = vadd.f32 %v1192_v6, %v1191_v45  ;;  %v1219_v37 = vsel %vm801_vm0, %v3646_v19, 0.0  ;;  %v3658_v43 = vpop.eup %1927  ;;  %v3701_v3 = vpop.permute.xlu0 %1316  ;;  %v4539_v45 = vld [vmem:[#allocation54_spill] sm:$0xff] }
 0x204   :  { %v1124_v48 = vadd.f32 %v3434_v47, %v1122_v33  ;;  %v1152_v54 = vadd.f32 %v3492_v23, %v1150_v53  ;;  %v1180_v15 = vadd.f32 %v3540_v10, %v1178_v62  ;;  %v1208_v31 = vadd.f32 %v1207_v41, %v1206_v28  ;;  %v3663_v61 = vpop.eup %1929  ;;  %v4540_v53 = vld [vmem:[#allocation16_spill] sm:$0xff]  ;;  %v4541_v28 = vld [vmem:[#allocation23_spill] sm:$0xff] }
 0x205   :  { %v1139_v60 = vadd.f32 %v3466_v24, %v1137_v36  ;;  %v1167_v0 = vadd.f32 %v3522_v38, %v1165_v9  ;;  %v1195_v55 = vadd.f32 %v1194_v4, %v1193_v7  ;;  %v1221_v6 = vadd.f32 %v1220_v5, %v1219_v37  ;;  %v3667_v46 = vpop.eup %1931  ;;  %v4542_v9 = vld [vmem:[#allocation3_spill] sm:$0xff] }
 0x206   :  { %v1126_v18 = vadd.f32 %v3388_v49, %v1124_v48  ;;  %v1154_v26 = vadd.f32 %v3496_v16, %v1152_v54  ;;  %v1182_v33 = vadd.f32 %v3551_v13, %v1180_v15  ;;  %v1210_v47 = vadd.f32 %v1209_v22, %v1208_v31  ;;  %v3672_v23 = vpop.eup %1933  ;;  %v4543_v48 = vld [vmem:[#allocation56_spill] sm:$0xff]  ;;  %v4544_v15 = vld [vmem:[#allocation7_spill] sm:$0xff] }
 0x207   :  { %v1141_v10 = vadd.f32 %v3462_v8, %v1139_v60  ;;  %v1169_v41 = vadd.f32 %v3526_v27, %v1167_v0  ;;  %v1197_v24 = vadd.f32 %v3575_v12, %v1195_v55  ;;  %v1223_v38 = vadd.f32 %v1222_v11, %v1221_v6  ;;  %v1315_v11 = vpop.permute.xlu1 %1314  ;;  %v4545_v60 = vld [vmem:[#allocation17_spill] sm:$0xff]  ;;  %v4546_v55 = vld [vmem:[#allocation18_spill] sm:$0xff] }
 0x208   :  { %v1128_v4 = vadd.f32 %v3438_v39, %v1126_v18  ;;  %v1156_v5 = vadd.f32 %v3488_v1, %v1154_v26  ;;  %v1184_v49 = vadd.f32 %v3555_v42, %v1182_v33  ;;  %v1212_v50 = vadd.f32 %v1211_v29, %v1210_v47  ;;  %v4547_v26 = vld [vmem:[#allocation57_spill] sm:$0xff] }
 0x209   :  { %v1143_v16 = vadd.f32 %v3470_v56, %v1141_v10  ;;  %v1171_v13 = vadd.f32 %v3514_v20, %v1169_v41  ;;  %v1199_v22 = vadd.f32 %v3579_v63, %v1197_v24  ;;  %v1225_v51 = vadd.f32 %v1224_v58, %v1223_v38  ;;  %v4548_v47 = vld [vmem:[#allocation33_spill] sm:$0xff]  ;;  %v4549_v38 = vld [vmem:[#allocation11_spill] sm:$0xff] }
 0x20a   :  { %v1158_v8 = vadd.f32 %v3502_v34, %v1156_v5  ;;  %v1186_v27 = vadd.f32 %v3547_v59, %v1184_v49  ;;  %v1214_v12 = vadd.f32 %v3615_v32, %v1212_v50  ;;  %1935 = vrcp.f32 %v1128_v4  ;;  %v4538_v34 = vld [vmem:[#allocation55_spill] sm:$0xff]  ;;  %v3731_v5 = vpop.permute.xlu0 %1320 }
 0x20b   :  { %v1173_v39 = vadd.f32 %v3532_v35, %v1171_v13  ;;  %v1201_v1 = vadd.f32 %v3586_v25, %v1199_v22  ;;  %v1227_v42 = vadd.f32 %v1226_v21, %v1225_v51  ;;  %1937 = vrcp.f32 %v1143_v16  ;;  %v3739_v13 = vpop.permute.xlu1 %1318  ;;  %v4550_v22 = vld [vmem:[#allocation31_spill] sm:$0xff] }
 0x20c   :  { %v1188_v29 = vadd.f32 %v3562_v14, %v1186_v27  ;;  %v1216_v20 = vadd.f32 %v3608_v30, %v1214_v12  ;;  %v1228_v63 = vsel %vm801_vm0, %v3663_v61, 0.0  ;;  %1939 = vrcp.f32 %v1158_v8  ;;  %v4551_v12 = vld [vmem:[#allocation29_spill] sm:$0xff] }
 0x20d   :  { %v1203_v56 = vadd.f32 %v4538_v34, %v1201_v1  ;;  %v1217_v59 = vsel %vm801_vm0, %v3658_v43, 0.0  ;;  %v1229_v32 = vadd.f32 %v1228_v63, %v1227_v42  ;;  %1941 = vrcp.f32 %v1173_v39 }
 0x20e   :  { %v1230_v35 = vsel %vm801_vm0, %v3667_v46, 0.0  ;;  %v1218_v21 = vadd.f32 %v1217_v59, %v1216_v20  ;;  %1943 = vrcp.f32 %v1188_v29  ;;  %v1232_v14 = vsel %vm801_vm0, %v3672_v23, 0.0  ;;  %v4552_v29 = vld [vmem:[#allocation45_spill] sm:$0xff] }
 0x20f   :  { %v1231_v25 = vadd.f32 %v1230_v35, %v1229_v32  ;;  %1945 = vrcp.f32 %v1203_v56  ;;  %v4553_v56 = vld [vmem:[#allocation10_spill] sm:$0xff]  ;;  %v4554_v32 = vld [vmem:[#allocation9_spill] sm:$0xff] }
 0x210   :  { %1947 = vrcp.f32 %v1218_v21 }
 0x211   :  { %v1233_v30 = vadd.f32 %v1232_v14, %v1231_v25  ;;  %v4555_v14 = vld [vmem:[#allocation20_spill] sm:$0xff] }
 0x213   :  { %1949 = vrcp.f32 %v1233_v30 }
 0x217   :  { %v3699_v58 = vpop.eup %1935 }
 0x218   :  { %v1938_v40 = vpop.eup %1937  ;;  %v1242_v17 = vmul.f32 %v3699_v58, %v4539_v45  ;;  %v1244_v62 = vmul.f32 %v3699_v58, %v4540_v53  ;;  %v1243_v36 = vmul.f32 %v3699_v58, %v4541_v28  ;;  %v3711_v7 = vmul.f32 %v3699_v58, %v4542_v9  ;;  %v4556_v45 = vld [vmem:[#allocation40_spill] sm:$0xff]  ;;  %v3779_v53 = vpop.permute.xlu1 %1322  ;;  %v4557_v28 = vld [vmem:[#allocation51_spill] sm:$0xff] }
 0x219   :  { %v3713_v37 = vpop.eup %1939  ;;  %v1250_v54 = vmul.f32 %v1938_v40, %v4543_v48  ;;  %v1252_v31 = vmul.f32 %v1938_v40, %v4544_v15  ;;  %v1251_v0 = vmul.f32 %v1938_v40, %v4545_v60  ;;  %v1253_v6 = vmul.f32 %v1938_v40, %v4546_v55  ;;  %v4558_v48 = vld [vmem:[#allocation44_spill] sm:$0xff]  ;;  %v4559_v15 = vld [vmem:[#allocation50_spill] sm:$0xff]  ;;  %v3793_v60 = vpop.permute.xlu0 %1324 }
 0x21a   :  { %v3719_v18 = vpop.eup %1941  ;;  %v1258_v33 = vmul.f32 %v3713_v37, %v4547_v26  ;;  %v1260_v10 = vmul.f32 %v3713_v37, %v4548_v47  ;;  %v3737_v16 = vmul.f32 %v1315_v11, %v1242_v17  ;;  %v3750_v1 = vmul.f32 %v3739_v13, %v1244_v62 }
 0x21b   :  { %v3725_v41 = vpop.eup %1943  ;;  %v1266_v24 = vmul.f32 %v3719_v18, %v3617_v2  ;;  %v1268_v4 = vmul.f32 %v3719_v18, %v4549_v38  ;;  %v1346_v27 = vmul.f32 %v1315_v11, %v1250_v54  ;;  %v1348_v63 = vmul.f32 %v3739_v13, %v1252_v31 }
 0x21c   :  { %v3733_v49 = vpop.eup %1945  ;;  %v1274_v50 = vmul.f32 %v3725_v41, %v3626_v52  ;;  %v1276_v51 = vmul.f32 %v3725_v41, %v4550_v22  ;;  %v3754_v42 = vmul.f32 %v1315_v11, %v1258_v33  ;;  %v1259_v59 = vmul.f32 %v3713_v37, %v4553_v56  ;;  %v3818_v22 = vpop.permute.xlu1 %1326 }
 0x21d   :  { %v3743_v8 = vpop.eup %1947  ;;  %v1282_v2 = vmul.f32 %v3733_v49, %v3633_v57  ;;  %v1284_v39 = vmul.f32 %v3733_v49, %v4551_v12  ;;  %v3759_v34 = vmul.f32 %v1315_v11, %v1266_v24  ;;  %v3762_v57 = vmul.f32 %v3739_v13, %v1260_v10 }
 0x21e   :  { %v1290_v52 = vmul.f32 %v3743_v8, %v3640_v44  ;;  %v1292_v20 = vmul.f32 %v3743_v8, %v4552_v29  ;;  %v1267_v35 = vmul.f32 %v3719_v18, %v4554_v32  ;;  %v3770_v44 = vmul.f32 %v1315_v11, %v1274_v50  ;;  %v4562_v29 = vld [vmem:[#allocation32_spill] sm:$0xff] }
 0x21f   :  { %v3773_v25 = vmul.f32 %v3739_v13, %v1268_v4  ;;  %v1275_v30 = vmul.f32 %v3725_v41, %v4555_v14  ;;  %v1283_v17 = vmul.f32 %v3733_v49, %v4556_v45  ;;  %v1291_v54 = vmul.f32 %v3743_v8, %v4558_v48  ;;  %v4564_v48 = vld [vmem:[#allocation24_spill] sm:$0xff] }
 0x220   :  { %v3768_v21 = vpop.eup %1949  ;;  %v3795_v55 = vmul.f32 %v1315_v11, %v1282_v2  ;;  %v3798_v26 = vmul.f32 %v3739_v13, %v1276_v51  ;;  %v1347_v33 = vmul.f32 %v3701_v3, %v1251_v0  ;;  %v3804_v47 = vmul.f32 %v1315_v11, %v1290_v52  ;;  %v4560_v51 = vld [vmem:[#allocation13_spill] sm:$0xff]  ;;  %v4561_v0 = vld [vmem:[#allocation19_spill] sm:$0xff]  ;;  %v3823_v52 = vpop.permute.xlu0 %1328 }
 0x221   :  { %v1298_v62 = vmul.f32 %v3768_v21, %v3646_v19  ;;  %v3785_v9 = vmul.f32 %v3768_v21, %v4557_v28  ;;  %v3791_v31 = vmul.f32 %v3768_v21, %v4559_v15  ;;  %v3801_v19 = vmul.f32 %v3739_v13, %v1284_v39 }
 0x222   :  { %v3807_v10 = vmul.f32 %v3739_v13, %v1292_v20  ;;  %v1339_v24 = vmul.f32 %v3701_v3, %v1243_v36  ;;  %v3811_v38 = vmul.f32 %v3701_v3, %v1259_v59  ;;  %v3816_v50 = vmul.f32 %v3701_v3, %v1267_v35  ;;  %v4563_v20 = vld [vmem:[#allocation8_spill] sm:$0xff] }
 0x223   :  { %v3813_v4 = vmul.f32 %v1315_v11, %v1298_v62  ;;  %v1254_v2 = vmul.f32 %v1938_v40, %v4560_v51  ;;  %v1255_v12 = vmul.f32 %v1938_v40, %v4561_v0  ;;  %v1371_v39 = vmul.f32 %v3701_v3, %v1275_v30  ;;  %v4565_v51 = vld [vmem:[#allocation22_spill] sm:$0xff]  ;;  %v4566_v0 = vld [vmem:[#allocation4_spill] sm:$0xff] }
 0x224   :  { %v1256_v36 = vmul.f32 %v1938_v40, %v4562_v29  ;;  %v1257_v56 = vmul.f32 %v1938_v40, %v4563_v20  ;;  %v1349_v11 = vmul.f32 %v3731_v5, %v1253_v6  ;;  %v1417_v35 = vsel %vm801_vm0, %v1346_v27, 0.0  ;;  %v4567_v29 = vld [vmem:[#allocation25_spill] sm:$0xff] }
 0x225   :  { %v1350_v59 = vmul.f32 %v3779_v53, %v1254_v2  ;;  %v1351_v32 = vmul.f32 %v3793_v60, %v1255_v12  ;;  %v1418_v14 = vsel %vm801_vm0, %v1347_v33, 0.0  ;;  %v3833_v45 = vmul.f32 %v3701_v3, %v1283_v17 }
 0x226   :  { %v1352_v30 = vmul.f32 %v3818_v22, %v1256_v36  ;;  %v1419_v62 = vadd.f32 %v1418_v14, %v1417_v35  ;;  %v1420_v28 = vsel %vm801_vm0, %v1348_v63, 0.0  ;;  %v1353_v40 = vmul.f32 %v3823_v52, %v1257_v56 }
 0x227   :  { %v1422_v6 = vsel %vm801_vm0, %v1349_v11, 0.0  ;;  %v1246_v15 = vmul.f32 %v3699_v58, %v4564_v48  ;;  %v1247_v27 = vmul.f32 %v3699_v58, %v4565_v51  ;;  %v3844_v33 = vmul.f32 %v3701_v3, %v1291_v54 }
 0x228   :  { %v1421_v17 = vadd.f32 %v1420_v28, %v1419_v62  ;;  %v1424_v2 = vsel %vm801_vm0, %v1350_v59, 0.0  ;;  %v1248_v12 = vmul.f32 %v3699_v58, %v4566_v0  ;;  %v1426_v63 = vsel %vm801_vm0, %v1351_v32, 0.0  ;;  %v4571_v0 = vld [vmem:[#allocation27_spill] sm:$0xff] }
 0x229   :  { %v1249_v36 = vmul.f32 %v3699_v58, %v4567_v29  ;;  %v1341_v20 = vmul.f32 %v3731_v5, %v3711_v7  ;;  %v1342_v56 = vmul.f32 %v3779_v53, %v1246_v15  ;;  %v1428_v54 = vsel %vm801_vm0, %v1352_v30, 0.0  ;;  %v4568_v15 = vld [vmem:[#allocation34_spill] sm:$0xff]  ;;  %v4572_v29 = vld [vmem:[#allocation21_spill] sm:$0xff] }
 0x22a   :  { %v1423_v11 = vadd.f32 %v1422_v6, %v1421_v17  ;;  %v1402_v35 = vsel %vm801_vm0, %v3737_v16, 0.0  ;;  %v1403_v59 = vsel %vm801_vm0, %v1339_v24, 0.0  ;;  %v1430_v14 = vsel %vm801_vm0, %v1353_v40, 0.0  ;;  %v4569_v40 = vld [vmem:[#allocation36_spill] sm:$0xff]  ;;  %v4570_v17 = vld [vmem:[#allocation15_spill] sm:$0xff] }
 0x22b   :  { %v1343_v32 = vmul.f32 %v3793_v60, %v1247_v27  ;;  %v1344_v62 = vmul.f32 %v3818_v22, %v1248_v12  ;;  %v1404_v58 = vadd.f32 %v1403_v59, %v1402_v35  ;;  %v1345_v7 = vmul.f32 %v3823_v52, %v1249_v36 }
 0x22c   :  { %v1425_v28 = vadd.f32 %v1424_v2, %v1423_v11  ;;  %v1405_v6 = vsel %vm801_vm0, %v3750_v1, 0.0  ;;  %v1407_v30 = vsel %vm801_vm0, %v1341_v20, 0.0  ;;  %v1409_v16 = vsel %vm801_vm0, %v1342_v56, 0.0 }
 0x22d   :  { %v1406_v48 = vadd.f32 %v1405_v6, %v1404_v58  ;;  %v1277_v24 = vmul.f32 %v3725_v41, %v4568_v15  ;;  %v1278_v51 = vmul.f32 %v3725_v41, %v4569_v40  ;;  %v1279_v2 = vmul.f32 %v3725_v41, %v4570_v17  ;;  %v4576_v17 = vld [vmem:[#allocation5_spill] sm:$0xff] }
 0x22e   :  { %v1427_v27 = vadd.f32 %v1426_v63, %v1425_v28  ;;  %v1280_v12 = vmul.f32 %v3725_v41, %v4571_v0  ;;  %v1281_v1 = vmul.f32 %v3725_v41, %v4572_v29  ;;  %v1411_v20 = vsel %vm801_vm0, %v1343_v32, 0.0 }
 0x22f   :  { %v1408_v36 = vadd.f32 %v1407_v30, %v1406_v48  ;;  %v1373_v56 = vmul.f32 %v3731_v5, %v1277_v24  ;;  %v1374_v11 = vmul.f32 %v3779_v53, %v1278_v51  ;;  %v1413_v59 = vsel %vm801_vm0, %v1344_v62, 0.0  ;;  %v4575_v51 = vld [vmem:[#allocation12_spill] sm:$0xff] }
 0x230   :  { %v1429_v35 = vadd.f32 %v1428_v54, %v1427_v27  ;;  %v1415_v63 = vsel %vm801_vm0, %v1345_v7, 0.0  ;;  %v1462_v58 = vsel %vm801_vm0, %v3770_v44, 0.0  ;;  %v1375_v6 = vmul.f32 %v3793_v60, %v1279_v2 }
 0x231   :  { %v1410_v28 = vadd.f32 %v1409_v16, %v1408_v36  ;;  %v1376_v41 = vmul.f32 %v3818_v22, %v1280_v12  ;;  %v1463_v30 = vsel %vm801_vm0, %v1371_v39, 0.0  ;;  %v1377_v48 = vmul.f32 %v3823_v52, %v1281_v1  ;;  %v4573_v16 = vld [vmem:[#allocation28_spill] sm:$0xff]  ;;  %v4574_v39 = vld [vmem:[#allocation2_spill] sm:$0xff] }
 0x232   :  { %v3887_v32 = vadd.f32 %v1430_v14, %v1429_v35  ;;  %v1464_v15 = vadd.f32 %v1463_v30, %v1462_v58  ;;  %v1465_v54 = vsel %vm801_vm0, %v3798_v26, 0.0  ;;  %v1467_v7 = vsel %vm801_vm0, %v1373_v56, 0.0  ;;  %v4577_v12 = vld [vmem:[#allocation6_spill] sm:$0xff] }
 0x233   :  { %v1412_v62 = vadd.f32 %v1411_v20, %v1410_v28  ;;  %v1469_v44 = vsel %vm801_vm0, %v1374_v11, 0.0  ;;  %v1261_v24 = vmul.f32 %v3713_v37, %v4573_v16  ;;  %v1262_v14 = vmul.f32 %v3713_v37, %v4574_v39  ;;  %v4580_v16 = vld [vmem:[#allocation48_spill] sm:$0xff]  ;;  %v4581_v39 = vld [vmem:[#allocation49_spill] sm:$0xff] }
 0x234   :  { %1530 = vperm.xlu0 %1800, %v3887_v32   ;;  %v1466_v40 = vadd.f32 %v1465_v54, %v1464_v15  ;;  %v1263_v27 = vmul.f32 %v3713_v37, %v4575_v51  ;;  %v1264_v26 = vmul.f32 %v3713_v37, %v4576_v17  ;;  %v1471_v0 = vsel %vm801_vm0, %v1375_v6, 0.0  ;;  %v4578_v54 = vld [vmem:[#allocation46_spill] sm:$0xff] }
 0x235   :  { %v1414_v2 = vadd.f32 %v1413_v59, %v1412_v62  ;;  %v1265_v29 = vmul.f32 %v3713_v37, %v4577_v12  ;;  %v1357_v1 = vmul.f32 %v3731_v5, %v1261_v24  ;;  %v1473_v20 = vsel %vm801_vm0, %v1376_v41, 0.0 }
 0x236   :  { %v1468_v36 = vadd.f32 %v1467_v7, %v1466_v40  ;;  %v1475_v56 = vsel %vm801_vm0, %v1377_v48, 0.0  ;;  %v1358_v11 = vmul.f32 %v3779_v53, %v1262_v14  ;;  %v1359_v58 = vmul.f32 %v3793_v60, %v1263_v27  ;;  %v4579_v7 = vld [vmem:[#allocation47_spill] sm:$0xff] }
 0x237   :  { %v3910_v35 = vadd.f32 %v1415_v63, %v1414_v2  ;;  %v1432_v59 = vsel %vm801_vm0, %v3754_v42, 0.0  ;;  %v1433_v28 = vsel %vm801_vm0, %v3811_v38, 0.0  ;;  %v1360_v6 = vmul.f32 %v3818_v22, %v1264_v26 }
 0x238   :  { %v1470_v37 = vadd.f32 %v1469_v44, %v1468_v36  ;;  %v1361_v30 = vmul.f32 %v3823_v52, %v1265_v29  ;;  %v1434_v41 = vadd.f32 %v1433_v28, %v1432_v59  ;;  %v1435_v63 = vsel %vm801_vm0, %v3762_v57, 0.0 }
 0x239   :  { %1525 = vperm.xlu1 %1799, %v3910_v35   ;;  %v1437_v48 = vsel %vm801_vm0, %v1357_v1, 0.0  ;;  %v1439_v15 = vsel %vm801_vm0, %v1358_v11, 0.0  ;;  %v1293_v42 = vmul.f32 %v3743_v8, %v4578_v54  ;;  %v1294_v44 = vmul.f32 %v3743_v8, %v4579_v7  ;;  %v4586_v54 = vld [vmem:[#allocation26_spill] sm:$0xff] }
 0x23a   :  { %v1472_v62 = vadd.f32 %v1471_v0, %v1470_v37  ;;  %v1436_v38 = vadd.f32 %v1435_v63, %v1434_v41  ;;  %v1295_v24 = vmul.f32 %v3743_v8, %v4580_v16  ;;  %v1441_v40 = vsel %vm801_vm0, %v1359_v58, 0.0  ;;  %v4584_v63 = vld [vmem:[#allocation39_spill] sm:$0xff] }
 0x23b   :  { %v1296_v57 = vmul.f32 %v3743_v8, %v4581_v39  ;;  %v1297_v14 = vmul.f32 %v3743_v8, %v3658_v43  ;;  %v1389_v51 = vmul.f32 %v3731_v5, %v1293_v42  ;;  %v1443_v26 = vsel %vm801_vm0, %v1360_v6, 0.0  ;;  %v4583_v6 = vld [vmem:[#allocation38_spill] sm:$0xff] }
 0x23c   :  { %v1474_v27 = vadd.f32 %v1473_v20, %v1472_v62  ;;  %v1438_v17 = vadd.f32 %v1437_v48, %v1436_v38  ;;  %v1390_v2 = vmul.f32 %v3779_v53, %v1294_v44  ;;  %v1445_v0 = vsel %vm801_vm0, %v1361_v30, 0.0 }
 0x23d   :  { %v1391_v12 = vmul.f32 %v3793_v60, %v1295_v24  ;;  %v1492_v29 = vsel %vm801_vm0, %v3804_v47, 0.0  ;;  %v1493_v1 = vsel %vm801_vm0, %v3844_v33, 0.0  ;;  %v1392_v8 = vmul.f32 %v3818_v22, %v1296_v57  ;;  %v4582_v33 = vld [vmem:[#allocation37_spill] sm:$0xff] }
 0x23e   :  { %v3944_v36 = vadd.f32 %v1475_v56, %v1474_v27  ;;  %v1440_v43 = vadd.f32 %v1439_v15, %v1438_v17  ;;  %v1494_v20 = vadd.f32 %v1493_v1, %v1492_v29  ;;  %v1393_v11 = vmul.f32 %v3823_v52, %v1297_v14  ;;  %v4588_v1 = vld [vmem:[#allocation30_spill] sm:$0xff] }
 0x23f   :  { %v1495_v58 = vsel %vm801_vm0, %v3807_v10, 0.0  ;;  %v1497_v59 = vsel %vm801_vm0, %v1389_v51, 0.0  ;;  %v1499_v28 = vsel %vm801_vm0, %v1390_v2, 0.0  ;;  %v1269_v56 = vmul.f32 %v3719_v18, %v4582_v33  ;;  %v4585_v10 = vld [vmem:[#allocation14_spill] sm:$0xff] }
 0x240   :  { %1545 = vperm.xlu0 %1800, %v3944_v36   ;;  %v1442_v47 = vadd.f32 %v1441_v40, %v1440_v43  ;;  %v1496_v37 = vadd.f32 %v1495_v58, %v1494_v20  ;;  %v1270_v30 = vmul.f32 %v3719_v18, %v4583_v6  ;;  %v1501_v41 = vsel %vm801_vm0, %v1391_v12, 0.0  ;;  %v4591_v58 = vld [vmem:[#allocation43_spill] sm:$0xff] }
 0x241   :  { %v1271_v48 = vmul.f32 %v3719_v18, %v4584_v63  ;;  %v1272_v15 = vmul.f32 %v3719_v18, %v4585_v10  ;;  %v1273_v42 = vmul.f32 %v3719_v18, %v4586_v54  ;;  %v1365_v7 = vmul.f32 %v3731_v5, %v1269_v56 }
 0x242   :  { %v1444_v62 = vadd.f32 %v1443_v26, %v1442_v47  ;;  %v1498_v38 = vadd.f32 %v1497_v59, %v1496_v37  ;;  %v1366_v44 = vmul.f32 %v3779_v53, %v1270_v30  ;;  %v1503_v16 = vsel %vm801_vm0, %v1392_v8, 0.0  ;;  %v4589_v8 = vld [vmem:[#allocation41_spill] sm:$0xff] }
 0x243   :  { %v1505_v24 = vsel %vm801_vm0, %v1393_v11, 0.0  ;;  %v1447_v40 = vsel %vm801_vm0, %v3759_v34, 0.0  ;;  %v1448_v39 = vsel %vm801_vm0, %v3816_v50, 0.0  ;;  %v1367_v18 = vmul.f32 %v3793_v60, %v1271_v48  ;;  %v4590_v11 = vld [vmem:[#allocation42_spill] sm:$0xff] }
 0x244   :  { %v3972_v57 = vadd.f32 %v1445_v0, %v1444_v62  ;;  %v1500_v14 = vadd.f32 %v1499_v28, %v1498_v38  ;;  %v1449_v51 = vadd.f32 %v1448_v39, %v1447_v40  ;;  %v1368_v27 = vmul.f32 %v3818_v22, %v1272_v15  ;;  %v4587_v0 = vld [vmem:[#allocation35_spill] sm:$0xff] }
 0x245   :  { %v1369_v17 = vmul.f32 %v3823_v52, %v1273_v42  ;;  %v1450_v26 = vsel %vm801_vm0, %v3773_v25, 0.0  ;;  %v1452_v2 = vsel %vm801_vm0, %v1365_v7, 0.0  ;;  %v1454_v50 = vsel %vm801_vm0, %v1366_v44, 0.0  ;;  %v4592_v42 = vld [vmem:[#allocation52_spill] sm:$0xff] }
 0x246   :  { %1535 = vperm.xlu1 %1799, %v3972_v57   ;;  %v1502_v34 = vadd.f32 %v1501_v41, %v1500_v14  ;;  %v1451_v12 = vadd.f32 %v1450_v26, %v1449_v51  ;;  %v1285_v29 = vmul.f32 %v3733_v49, %v4587_v0  ;;  %v1286_v43 = vmul.f32 %v3733_v49, %v4588_v1 }
 0x247   :  { %v1287_v20 = vmul.f32 %v3733_v49, %v4589_v8  ;;  %v1288_v25 = vmul.f32 %v3733_v49, %v4590_v11  ;;  %v1289_v59 = vmul.f32 %v3733_v49, %v4591_v58  ;;  %v1396_v28 = vmul.f32 %v3739_v13, %v3785_v9 }
 0x248   :  { %v1504_v47 = vadd.f32 %v1503_v16, %v1502_v34  ;;  %v1453_v37 = vadd.f32 %v1452_v2, %v1451_v12  ;;  %v1381_v33 = vmul.f32 %v3731_v5, %v1285_v29  ;;  %v1395_v56 = vmul.f32 %v3701_v3, %v3791_v31 }
 0x249   :  { %v1456_v6 = vsel %vm801_vm0, %v1367_v18, 0.0  ;;  %v1458_v30 = vsel %vm801_vm0, %v1368_v27, 0.0  ;;  %v1477_v41 = vsel %vm801_vm0, %v3795_v55, 0.0  ;;  %v1382_v48 = vmul.f32 %v3779_v53, %v1286_v43 }
 0x24a   :  { %v4001_v63 = vadd.f32 %v1505_v24, %v1504_v47  ;;  %v1455_v49 = vadd.f32 %v1454_v50, %v1453_v37  ;;  %v1478_v13 = vsel %vm801_vm0, %v3833_v45, 0.0  ;;  %v1460_v9 = vsel %vm801_vm0, %v1369_v17, 0.0  ;;  %v4593_v45 = vld [vmem:[#allocation53_spill] sm:$0xff] }
 0x24b   :  { %v1383_v10 = vmul.f32 %v3793_v60, %v1287_v20  ;;  %v1384_v3 = vmul.f32 %v3818_v22, %v1288_v25  ;;  %v1479_v31 = vadd.f32 %v1478_v13, %v1477_v41  ;;  %v1480_v55 = vsel %vm801_vm0, %v3801_v19, 0.0 }
 0x24c   :  { %1555 = vperm.xlu0 %1800, %v4001_v63   ;;  %v1457_v15 = vadd.f32 %v1456_v6, %v1455_v49  ;;  %v1482_v54 = vsel %vm801_vm0, %v1381_v33, 0.0  ;;  %v1301_v62 = vmul.f32 %v3768_v21, %v4592_v42  ;;  %v1302_v7 = vmul.f32 %v3768_v21, %v4593_v45 }
 0x24d   :  { %v1481_v38 = vadd.f32 %v1480_v55, %v1479_v31  ;;  %v1303_v44 = vmul.f32 %v3768_v21, %v3663_v61  ;;  %v1304_v16 = vmul.f32 %v3768_v21, %v3667_v46  ;;  %v1484_v40 = vsel %vm801_vm0, %v1382_v48, 0.0 }
 0x24e   :  { %v1459_v24 = vadd.f32 %v1458_v30, %v1457_v15  ;;  %v1305_v19 = vmul.f32 %v3768_v21, %v3672_v23  ;;  %v1397_v39 = vmul.f32 %v3731_v5, %v1301_v62  ;;  %v1385_v14 = vmul.f32 %v3823_v52, %v1289_v59  ;;  %v4080_v15 = vld [vmem:[%s4190_s6 + $0x1] ss:$0 sm:$0xff] }
 0x24f   :  { %v1483_v18 = vadd.f32 %v1482_v54, %v1481_v38  ;;  %v4594_v27 = vmov 1   ;;  %v1398_v17 = vmul.f32 %v3779_v53, %v1302_v7  ;;  %v1507_v61 = vsel %vm801_vm0, %v3813_v4, 0.0  ;;  %v4087_v54 = vld [vmem:[%s4190_s6] ss:$0 sm:$0xff]  ;;  %v4093_v38 = vld [vmem:[%s4190_s6 + $0x3] ss:$0 sm:$0xff] }
 0x250   :  { %v1461_v51 = vadd.f32 %v1460_v9, %v1459_v24  ;;  %1801 = vset.pattern.permute.xlu0 %v4594_v27  ;;  %v1508_v46 = vsel %vm801_vm0, %v1395_v56, 0.0  ;;  %v1486_v23 = vsel %vm801_vm0, %v1383_v10, 0.0  ;;  %v1488_v5 = vsel %vm801_vm0, %v1384_v3, 0.0  ;;  %v4099_v7 = vld [vmem:[%s4190_s6 + $0x2] ss:$0 sm:$0xff] }
 0x251   :  { %v1485_v26 = vadd.f32 %v1484_v40, %v1483_v18  ;;  %1577 = vperm.xlu0 %1801, %v3910_v35   ;;  %v1509_v2 = vadd.f32 %v1508_v46, %v1507_v61  ;;  %v1510_v21 = vsel %vm801_vm0, %v1396_v28, 0.0  ;;  %v1512_v34 = vsel %vm801_vm0, %v1397_v39, 0.0  ;;  %v4106_v18 = vld [vmem:[%s4191_s7] ss:$0 sm:$0xff] }
 0x252   :  { %1540 = vperm.xlu1 %1799, %v1461_v51   ;;  %v1490_v50 = vsel %vm801_vm0, %v1385_v14, 0.0  ;;  %v1399_v4 = vmul.f32 %v3793_v60, %v1303_v44  ;;  %v1400_v0 = vmul.f32 %v3818_v22, %v1304_v16  ;;  %v1514_v29 = vsel %vm801_vm0, %v1398_v17, 0.0 }
 0x253   :  { %v1487_v12 = vadd.f32 %v1486_v23, %v1485_v26  ;;  %v1511_v53 = vadd.f32 %v1510_v21, %v1509_v2  ;;  %v1401_v8 = vmul.f32 %v3823_v52, %v1305_v19  ;;  %v4595_v47 = vmov 2  }
 0x254   :  { %v1516_v25 = vsel %vm801_vm0, %v1399_v4, 0.0  ;;  %v1518_v58 = vsel %vm801_vm0, %v1400_v0, 0.0  ;;  %v4596_v52 = vmov 3  }
 0x255   :  { %v1489_v1 = vadd.f32 %v1488_v5, %v1487_v12  ;;  %v1513_v43 = vadd.f32 %v1512_v34, %v1511_v53  ;;  %1589 = vperm.xlu0 %1801, %v1461_v51   ;;  %v1520_v60 = vsel %vm801_vm0, %v1401_v8, 0.0 }
 0x257   :  { %v1491_v20 = vadd.f32 %v1490_v50, %v1489_v1  ;;  %v1515_v11 = vadd.f32 %v1514_v29, %v1513_v43 }
 0x259   :  { %1550 = vperm.xlu1 %1799, %v1491_v20   ;;  %v1517_v59 = vadd.f32 %v1516_v25, %v1515_v11  ;;  %1597 = vperm.xlu0 %1801, %v1491_v20  }
 0x25b   :  { %v1519_v28 = vadd.f32 %v1518_v58, %v1517_v59 }
 0x25d   :  { %v1521_v22 = vadd.f32 %v1520_v60, %v1519_v28 }
 0x25f   :  { %1560 = vperm.xlu1 %1799, %v1521_v22   ;;  %1605 = vperm.xlu0 %1801, %v1521_v22  }
 0x263   :  { %1802 = vset.pattern.permute.xlu1 %v4594_v27  ;;  %1804 = vset.pattern.permute.xlu0 %v4595_v47 }
 0x264   :  { %1581 = vperm.xlu1 %1802, %v3887_v32   ;;  %1634 = vperm.xlu0 %1804, %v3887_v32  }
 0x268   :  { %1585 = vperm.xlu1 %1802, %v3972_v57   ;;  %1646 = vperm.xlu0 %1804, %v3944_v36  }
 0x26c   :  { %1593 = vperm.xlu1 %1802, %v3944_v36   ;;  %1654 = vperm.xlu0 %1804, %v4001_v63  }
 0x270   :  { %1601 = vperm.xlu1 %1802, %v4001_v63   ;;  %1805 = vset.pattern.permute.xlu0 %v4596_v52 }
 0x271   :  { %1683 = vperm.xlu0 %1805, %v3910_v35  }
 0x274   :  { %1803 = vset.pattern.permute.xlu1 %v4595_v47 }
 0x275   :  { %1630 = vperm.xlu1 %1803, %v3910_v35   ;;  %1695 = vperm.xlu0 %1805, %v1461_v51  }
 0x279   :  { %1638 = vperm.xlu1 %1803, %v3972_v57   ;;  %1703 = vperm.xlu0 %1805, %v1491_v20  }
 0x27d   :  { %1642 = vperm.xlu1 %1803, %v1461_v51   ;;  %1711 = vperm.xlu0 %1805, %v1521_v22  }
 0x281   :  { %1650 = vperm.xlu1 %1803, %v1491_v20  }
 0x285   :  { %1658 = vperm.xlu1 %1803, %v1521_v22  }
 0x289   :  { %1806 = vset.pattern.permute.xlu1 %v4596_v52 }
 0x28a   :  { %1687 = vperm.xlu1 %1806, %v3887_v32  }
 0x28e   :  { %1691 = vperm.xlu1 %1806, %v3972_v57  }
 0x292   :  { %1699 = vperm.xlu1 %1806, %v3944_v36  }
 0x296   :  { %1707 = vperm.xlu1 %1806, %v4001_v63  }
 0x2af   :  { %v4063_v37 = vpop.permute.xlu0 %1530 }
 0x2b0   :  { %v1568_v47 = vmul.f32 %v4087_v54, %v4063_v37 }
 0x2b4   :  { %v1526_v33 = vpop.permute.xlu1 %1525 }
 0x2b5   :  { %v1567_v45 = vmul.f32 %v4087_v54, %v1526_v33 }
 0x2bb   :  { %v4065_v35 = vpop.permute.xlu0 %1545 }
 0x2c1   :  { %v4069_v6 = vpop.permute.xlu1 %1535 }
 0x2c7   :  { %v4067_v56 = vpop.permute.xlu0 %1555 }
 0x2cc   :  { %v1578_v30 = vpop.permute.xlu0 %1577 }
 0x2cd   :  { %v1541_v41 = vpop.permute.xlu1 %1540  ;;  %v1612_v62 = vmul.f32 %v4080_v15, %v1578_v30 }
 0x2ce   :  { %v1570_v17 = vmul.f32 %v4087_v54, %v1541_v41 }
 0x2cf   :  { %v1620_v16 = vadd.f32 %v1612_v62, %v1567_v45  ;;  %v1571_v45 = vmul.f32 %v4087_v54, %v4065_v35 }
 0x2d0   :  { %v1590_v49 = vpop.permute.xlu0 %1589 }
 0x2d1   :  { %v1615_v51 = vmul.f32 %v4080_v15, %v1590_v49 }
 0x2d3   :  { %v1623_v23 = vadd.f32 %v1615_v51, %v1570_v17 }
 0x2d4   :  { %v1551_v48 = vpop.permute.xlu1 %1550  ;;  %v1598_v32 = vpop.permute.xlu0 %1597 }
 0x2d5   :  { %v1617_v46 = vmul.f32 %v4080_v15, %v1598_v32  ;;  %v1572_v34 = vmul.f32 %v4087_v54, %v1551_v48 }
 0x2d7   :  { %v1625_v53 = vadd.f32 %v1617_v46, %v1572_v34 }
 0x2da   :  { %v1561_v13 = vpop.permute.xlu1 %1560  ;;  %v1606_v57 = vpop.permute.xlu0 %1605 }
 0x2db   :  { %v1619_v4 = vmul.f32 %v4080_v15, %v1606_v57  ;;  %v1574_v8 = vmul.f32 %v4087_v54, %v1561_v13  ;;  %v1569_v13 = vmul.f32 %v4087_v54, %v4069_v6 }
 0x2dd   :  { %v1627_v59 = vadd.f32 %v1619_v4, %v1574_v8 }
 0x2df   :  { %v1582_v9 = vpop.permute.xlu1 %1581  ;;  %v1635_v36 = vpop.permute.xlu0 %1634 }
 0x2e0   :  { %v1613_v25 = vmul.f32 %v4080_v15, %v1582_v9  ;;  %v1666_v52 = vmul.f32 %v4099_v7, %v1635_v36 }
 0x2e2   :  { %v1621_v41 = vadd.f32 %v1613_v25, %v1568_v47 }
 0x2e3   :  { %v1586_v10 = vpop.permute.xlu1 %1585  ;;  %v4071_v63 = vpop.permute.xlu0 %1646 }
 0x2e4   :  { %v1614_v49 = vmul.f32 %v4080_v15, %v1586_v10  ;;  %v1674_v57 = vadd.f32 %v1666_v52, %v1621_v41 }
 0x2e7   :  { %v4073_v3 = vpop.permute.xlu1 %1593  ;;  %v4075_v31 = vpop.permute.xlu0 %1654 }
 0x2e8   :  { %v1616_v10 = vmul.f32 %v4080_v15, %v4073_v3  ;;  %v1671_v51 = vmul.f32 %v4099_v7, %v4075_v31 }
 0x2eb   :  { %v4082_v55 = vpop.permute.xlu1 %1601 }
 0x2ec   :  { %v1684_v42 = vpop.permute.xlu0 %1683  ;;  %v1618_v3 = vmul.f32 %v4080_v15, %v4082_v55 }
 0x2ed   :  { %v1718_v40 = vmul.f32 %v4093_v38, %v1684_v42  ;;  %v1622_v42 = vadd.f32 %v1614_v49, %v1569_v13 }
 0x2f0   :  { %v1631_v44 = vpop.permute.xlu1 %1630  ;;  %v1696_v19 = vpop.permute.xlu0 %1695 }
 0x2f1   :  { %v1665_v24 = vmul.f32 %v4099_v7, %v1631_v44  ;;  %v1721_v21 = vmul.f32 %v4093_v38, %v1696_v19  ;;  %v1669_v44 = vmul.f32 %v4099_v7, %v4071_v63  ;;  %v1624_v19 = vadd.f32 %v1616_v10, %v1571_v45 }
 0x2f3   :  { %v1673_v39 = vadd.f32 %v1665_v24, %v1620_v16  ;;  %v1677_v63 = vadd.f32 %v1669_v44, %v1624_v19 }
 0x2f4   :  { %v1639_v14 = vpop.permute.xlu1 %1638  ;;  %v1704_v2 = vpop.permute.xlu0 %1703 }
 0x2f5   :  { %v1726_v27 = vadd.f32 %v1718_v40, %v1673_v39  ;;  %v1723_v1 = vmul.f32 %v4093_v38, %v1704_v2  ;;  %v1667_v37 = vmul.f32 %v4099_v7, %v1639_v14  ;;  %v1573_v39 = vmul.f32 %v4087_v54, %v4067_v56 }
 0x2f7   :  { %v1741_v61 = vadd.f32 %v4106_v18, %v1726_v27  ;;  %v1675_v16 = vadd.f32 %v1667_v37, %v1622_v42 }
 0x2f8   :  { %v1643_v26 = vpop.permute.xlu1 %1642  ;;  %v1712_v43 = vpop.permute.xlu0 %1711 }
 0x2f9   :  { %1749 = vst.msk [vmem:[%s4192_s8] sm:$0x3] %vm801_vm0, %v1741_v61  ;;  %v1668_v5 = vmul.f32 %v4099_v7, %v1643_v26  ;;  %v1725_v22 = vmul.f32 %v4093_v38, %v1712_v43  ;;  %v1626_v61 = vadd.f32 %v1618_v3, %v1573_v39 }
 0x2fb   :  { %v1676_v12 = vadd.f32 %v1668_v5, %v1623_v23  ;;  %v1679_v46 = vadd.f32 %v1671_v51, %v1626_v61 }
 0x2fc   :  { %v1651_v50 = vpop.permute.xlu1 %1650 }
 0x2fd   :  { %v1729_v0 = vadd.f32 %v1721_v21, %v1676_v12  ;;  %v1670_v29 = vmul.f32 %v4099_v7, %v1651_v50 }
 0x2ff   :  { %v1744_v20 = vadd.f32 %v4106_v18, %v1729_v0  ;;  %v1678_v11 = vadd.f32 %v1670_v29, %v1625_v53 }
 0x300   :  { %v1659_v58 = vpop.permute.xlu1 %1658 }
 0x301   :  { %1752 = vst.msk [vmem:[%s4192_s8 + $0x6] sm:$0x3] %vm801_vm0, %v1744_v20  ;;  %v1731_v60 = vadd.f32 %v1723_v1, %v1678_v11  ;;  %v1672_v28 = vmul.f32 %v4099_v7, %v1659_v58 }
 0x303   :  { %v1746_v33 = vadd.f32 %v4106_v18, %v1731_v60  ;;  %v1680_v30 = vadd.f32 %v1672_v28, %v1627_v59 }
 0x305   :  { %1754 = vst.msk [vmem:[%s4192_s8 + $0xa] sm:$0x3] %vm801_vm0, %v1746_v33  ;;  %v1733_v48 = vadd.f32 %v1725_v22, %v1680_v30  ;;  %v1688_v32 = vpop.permute.xlu1 %1687 }
 0x306   :  { %v1719_v9 = vmul.f32 %v4093_v38, %v1688_v32 }
 0x307   :  { %v1748_v36 = vadd.f32 %v4106_v18, %v1733_v48 }
 0x308   :  { %v1727_v62 = vadd.f32 %v1719_v9, %v1674_v57 }
 0x309   :  { %1756 = vst.msk [vmem:[%s4192_s8 + $0xe] sm:$0x3] %vm801_vm0, %v1748_v36  ;;  %v1692_v6 = vpop.permute.xlu1 %1691 }
 0x30a   :  { %v1742_v24 = vadd.f32 %v4106_v18, %v1727_v62  ;;  %v1720_v40 = vmul.f32 %v4093_v38, %v1692_v6 }
 0x30c   :  { %1750 = vst.msk [vmem:[%s4192_s8 + $0x2] sm:$0x3] %vm801_vm0, %v1742_v24  ;;  %v1728_v35 = vadd.f32 %v1720_v40, %v1675_v16 }
 0x30d   :  { %v1700_v14 = vpop.permute.xlu1 %1699 }
 0x30e   :  { %v1743_v27 = vadd.f32 %v4106_v18, %v1728_v35  ;;  %v1722_v17 = vmul.f32 %v4093_v38, %v1700_v14 }
 0x310   :  { %1751 = vst.msk [vmem:[%s4192_s8 + $0x4] sm:$0x3] %vm801_vm0, %v1743_v27  ;;  %v1730_v15 = vadd.f32 %v1722_v17, %v1677_v63 }
 0x311   :  { %v1708_v55 = vpop.permute.xlu1 %1707 }
 0x312   :  { %v1745_v56 = vadd.f32 %v4106_v18, %v1730_v15  ;;  %v1724_v54 = vmul.f32 %v4093_v38, %v1708_v55 }
 0x314   :  { %1753 = vst.msk [vmem:[%s4192_s8 + $0x8] sm:$0x3] %vm801_vm0, %v1745_v56  ;;  %v1732_v31 = vadd.f32 %v1724_v54, %v1679_v46 }
 0x316   :  { %v1747_v7 = vadd.f32 %v4106_v18, %v1732_v31 }
 0x318   :  { %1755 = vst.msk [vmem:[%s4192_s8 + $0xc] sm:$0x3] %vm801_vm0, %v1747_v7 }

</bundles_post_ra>
